<compile_context>
chip_gen: v7x
topology: tpu7x:2x2x1
jax: 0.10.0
libtpu: 0.0.40
codegen_flags: <defaults>
</compile_context>

<pallas_src>
import functools

import jax
import jax.numpy as jnp
import numpy as np
from jax.experimental import pallas as pl
from jax.experimental.pallas import tpu as pltpu


def _round_up(v, m):
    return (v + m - 1) // m * m


def vat_kernel(x_ref, d0_ref, w_ref, wt_ref, b_ref, out_ref, *,
               xi, eps, ip, num_classes, batch, tile_rows):
    f32 = jnp.float32
    bf16 = jnp.bfloat16

    x = x_ref[...]        # (TB, DPAD) bf16
    W = w_ref[...]        # (DPAD, CPAD) bf16
    WT = wt_ref[...]      # (CPAD, DPAD) bf16 (pre-transposed in the wrapper)
    bias = b_ref[...]     # (1, CPAD) f32 (-1e30 on padded classes)

    def log_softmax(z):
        m = jnp.max(z, axis=1, keepdims=True)
        s = z - m
        return s - jnp.log(jnp.sum(jnp.exp(s), axis=1, keepdims=True))

    def l2_normalize(v):
        # torch: v / (||v||_2 + 1e-8); reciprocal goes to the EUP slot.
        n = jnp.sqrt(jnp.sum(v * v, axis=1, keepdims=True))
        return v * pl.reciprocal(n + 1e-8, approx=True)

    # Hoisted via linearity of the classifier: compute x@W once.
    zx = jnp.dot(x, W, preferred_element_type=f32) + bias      # (TB, CPAD) f32
    logp = log_softmax(zx)
    pred = jnp.exp(logp)                                       # softmax(model(x))

    # d = l2_normalize(randn_like(x))
    d = l2_normalize(d0_ref[...].astype(f32))                  # (TB, DPAD) f32

    inv_b = 1.0 / float(batch)

    def power_iter(_, d):
        zd = jnp.dot(d.astype(bf16), W, preferred_element_type=f32)
        p_hat = jnp.exp(log_softmax(zx + xi * zd))
        # grad of KL(pred || softmax) w.r.t. d; xi folded into the scalar.
        g = (p_hat - pred) * (xi * inv_b)                      # (TB, CPAD) f32
        g_x = jnp.dot(g.astype(bf16), WT, preferred_element_type=f32)
        return l2_normalize(g_x)

    if ip <= 2:
        for _ in range(ip):
            d = power_iter(0, d)
    else:
        d = jax.lax.fori_loop(0, ip, power_iter, d)

    # LDS = KL(pred || softmax(model(x + eps * d))), reduction='batchmean'
    zd = jnp.dot(d.astype(bf16), W, preferred_element_type=f32)
    logp_hat = log_softmax(zx + eps * zd)

    kl = pred * (logp - logp_hat)                              # (TB, CPAD)
    col = jax.lax.broadcasted_iota(jnp.int32, kl.shape, 1)
    row = (jax.lax.broadcasted_iota(jnp.int32, kl.shape, 0)
           + pl.program_id(0) * tile_rows)
    kl = jnp.where((col < num_classes) & (row < batch), kl, 0.0)

    # Lane-dense (8, CPAD) per-tile partial; final sum + /B happens outside.
    acc = kl[0:8, :]
    for r in range(8, tile_rows, 8):
        acc = acc + kl[r:r + 8, :]
    out_ref[...] = acc


def vat_loss_pallas(x_nchw, d_noise, W, b, *, xi=10.0, eps=1.0, ip=1):
    B = x_nchw.shape[0]
    D = int(np.prod(x_nchw.shape[1:]))
    C = W.shape[1]

    DPAD = _round_up(max(D, 128), 128)
    CPAD = _round_up(max(C, 128), 128)

    x = jnp.reshape(x_nchw, (B, D)).astype(jnp.float32)
    d0 = jnp.reshape(d_noise, (B, D)).astype(jnp.float32)

    # Tile rows: keep (bf16 x/d0 double-buffered + f32 temporaries) well under
    # the scoped VMEM limit (sized for v7x's 64 MiB physical VMEM as well).
    bytes_per_row = DPAD * 16
    TB = int(min(512, max(8, (24 * 1024 * 1024) // bytes_per_row)))
    TB = max(8, (TB // 8) * 8)
    TB = min(TB, _round_up(B, 8))
    BPAD = _round_up(B, TB)
    num_tiles = BPAD // TB

    def pad2(a, rows, cols):
        return jnp.pad(a, ((0, rows - a.shape[0]), (0, cols - a.shape[1])))

    xb = pad2(x, BPAD, DPAD).astype(jnp.bfloat16)
    db = pad2(d0, BPAD, DPAD).astype(jnp.bfloat16)
    Wp = pad2(W.astype(jnp.float32), DPAD, CPAD).astype(jnp.bfloat16)
    WTp = jnp.transpose(Wp)                                    # (CPAD, DPAD) once
    bp = jnp.full((1, CPAD), -1e30, jnp.float32)
    bp = bp.at[0, :C].set(jnp.reshape(b, (-1,)).astype(jnp.float32))

    kernel = functools.partial(
        vat_kernel, xi=float(xi), eps=float(eps), ip=int(ip),
        num_classes=C, batch=B, tile_rows=TB)

    partials = pl.pallas_call(
        kernel,
        out_shape=jax.ShapeDtypeStruct((num_tiles * 8, CPAD), jnp.float32),
        grid=(num_tiles,),
        in_specs=[
            pl.BlockSpec((TB, DPAD), lambda i: (i, 0)),        # x tile (streamed)
            pl.BlockSpec((TB, DPAD), lambda i: (i, 0)),        # d0 tile (streamed)
            pl.BlockSpec((DPAD, CPAD), lambda i: (0, 0)),      # W   (resident)
            pl.BlockSpec((CPAD, DPAD), lambda i: (0, 0)),      # W^T (resident)
            pl.BlockSpec((1, CPAD), lambda i: (0, 0)),         # bias
        ],
        out_specs=pl.BlockSpec((8, CPAD), lambda i: (i, 0)),   # per-tile partial
        compiler_params=pltpu.CompilerParams(
            dimension_semantics=("parallel",),
            vmem_limit_bytes=48 * 1024 * 1024,
        ),
    )(xb, db, Wp, WTp, bp)

    return jnp.sum(partials) / B


def vat_loss_ref(x_nchw, d_noise, W, b, *, xi=10.0, eps=1.0, ip=1):
    """Pure-JAX reference with the same math (linearity hoist, bf16 matmul
    operands with f32 accumulation, xi folded into the gradient scale)."""
    B = x_nchw.shape[0]
    D = int(np.prod(x_nchw.shape[1:]))
    x = jnp.reshape(x_nchw, (B, D)).astype(jnp.float32)
    d = jnp.reshape(d_noise, (B, D)).astype(jnp.float32)
    b2 = jnp.reshape(b, (1, -1)).astype(jnp.float32)
    Wb = W.astype(jnp.bfloat16)

    def mm(a, bb):
        return jnp.dot(a.astype(jnp.bfloat16), bb,
                       preferred_element_type=jnp.float32)

    def log_softmax(z):
        m = jnp.max(z, axis=1, keepdims=True)
        s = z - m
        return s - jnp.log(jnp.sum(jnp.exp(s), axis=1, keepdims=True))

    def l2n(v):
        n = jnp.sqrt(jnp.sum(v * v, axis=1, keepdims=True))
        return v / (n + 1e-8)

    zx = mm(x, Wb) + b2
    logp = log_softmax(zx)
    pred = jnp.exp(logp)
    d = l2n(d)
    for _ in range(ip):
        p_hat = jnp.exp(log_softmax(zx + xi * mm(d, Wb)))
        g = (p_hat - pred) * (xi / B)
        d = l2n(mm(g, Wb.T))
    logp_hat = log_softmax(zx + eps * mm(d, Wb))
    return jnp.sum(pred * (logp - logp_hat)) / B


if __name__ == "__main__":
    # Small NCHW image input + synthetic linear classifier.
    B, C, H, Wd = 2, 4, 16, 16
    NUM_CLASSES = 10
    D = C * H * Wd

    key = jax.random.PRNGKey(0)
    kx, kd, kw = jax.random.split(key, 3)

    x = jax.random.normal(kx, (B, C, H, Wd), dtype=jnp.float32)
    d_noise = jax.random.normal(kd, (B, C, H, Wd), dtype=jnp.float32)  # randn_like(x)
    W = jax.random.normal(kw, (D, NUM_CLASSES), dtype=jnp.float32) * 0.02
    bias = jnp.zeros((NUM_CLASSES,), dtype=jnp.float32)

    lds = jax.block_until_ready(
        vat_loss_pallas(x, d_noise, W, bias, xi=10.0, eps=1.0, ip=1))
    lds_ref = jax.block_until_ready(
        vat_loss_ref(x, d_noise, W, bias, xi=10.0, eps=1.0, ip=1))

    # Loose-ish tolerance accounts for the approx (EUP) reciprocal used only
    # inside the kernel's l2 normalization.
    np.testing.assert_allclose(np.asarray(lds), np.asarray(lds_ref),
                               rtol=2e-2, atol=1e-6)

    print("KERNEL_OK")
</pallas_src>

<mosaic_0001>
module attributes {stable_mosaic.version = 11 : i64} {
  func.func @vat_kernel(%arg0: i32, %arg1: memref<8x1024xbf16, #tpu.memory_space<vmem>>, %arg2: memref<8x1024xbf16, #tpu.memory_space<vmem>>, %arg3: memref<1024x128xbf16, #tpu.memory_space<vmem>>, %arg4: memref<128x1024xbf16, #tpu.memory_space<vmem>>, %arg5: memref<1x128xf32, #tpu.memory_space<vmem>>, %arg6: memref<8x128xf32, #tpu.memory_space<vmem>>) attributes {dimension_semantics = [#tpu.dimension_semantics<parallel>], iteration_bounds = array<i64: 1>, scalar_prefetch = 0 : i64, scratch_operands = 0 : i64, tpu.core_type = #tpu.core_type<tc>, window_params = [{transform_indices = @transform_0, window_bounds = array<i64: 8, 1024>}, {transform_indices = @transform_1, window_bounds = array<i64: 8, 1024>}, {pipeline_mode = #tpu.pipeline_mode<synchronous>, transform_indices = @transform_2, window_bounds = array<i64: 1024, 128>}, {pipeline_mode = #tpu.pipeline_mode<synchronous>, transform_indices = @transform_3, window_bounds = array<i64: 128, 1024>}, {pipeline_mode = #tpu.pipeline_mode<synchronous>, transform_indices = @transform_4, window_bounds = array<i64: 1, 128>}, {transform_indices = @transform_5, window_bounds = array<i64: 8, 128>}]} {
    %c0 = arith.constant 0 : index
    %c0_0 = arith.constant 0 : index
    %0 = vector.load %arg1[%c0, %c0_0] : memref<8x1024xbf16, #tpu.memory_space<vmem>>, vector<8x1024xbf16>
    %c0_1 = arith.constant 0 : index
    %c0_2 = arith.constant 0 : index
    %1 = vector.load %arg3[%c0_1, %c0_2] : memref<1024x128xbf16, #tpu.memory_space<vmem>>, vector<1024x128xbf16>
    %c0_3 = arith.constant 0 : index
    %c0_4 = arith.constant 0 : index
    %2 = vector.load %arg4[%c0_3, %c0_4] : memref<128x1024xbf16, #tpu.memory_space<vmem>>, vector<128x1024xbf16>
    %c0_5 = arith.constant 0 : index
    %c0_6 = arith.constant 0 : index
    %3 = vector.load %arg5[%c0_5, %c0_6] : memref<1x128xf32, #tpu.memory_space<vmem>>, vector<1x128xf32>
    %cst = arith.constant dense<0.000000e+00> : vector<8x128xf32>
    %4 = tpu.matmul %0, %1, %cst {dimension_numbers = #tpu.dot_dimension_numbers<[1], [0], [0], [1], [0, 0, 1, 1], [], []>} : vector<8x1024xbf16>, vector<1024x128xbf16>, vector<8x128xf32> -> vector<8x128xf32>
    %5 = vector.broadcast %3 : vector<1x128xf32> to vector<8x128xf32>
    %6 = arith.addf %4, %5 : vector<8x128xf32>
    %cst_7 = arith.constant dense<0xFF800000> : vector<8xf32>
    %7 = vector.multi_reduction <maximumf>, %6, %cst_7 [1] : vector<8x128xf32> to vector<8xf32>
    %8 = vector.shape_cast %7 : vector<8xf32> to vector<8x1xf32>
    %9 = vector.broadcast %8 : vector<8x1xf32> to vector<8x128xf32>
    %10 = arith.subf %6, %9 : vector<8x128xf32>
    %11 = math.exp %10 : vector<8x128xf32>
    %cst_8 = arith.constant dense<0.000000e+00> : vector<8xf32>
    %12 = vector.multi_reduction <add>, %11, %cst_8 [1] : vector<8x128xf32> to vector<8xf32>
    %13 = vector.shape_cast %12 : vector<8xf32> to vector<8x1xf32>
    %14 = math.log %13 : vector<8x1xf32>
    %15 = vector.broadcast %14 : vector<8x1xf32> to vector<8x128xf32>
    %16 = arith.subf %10, %15 : vector<8x128xf32>
    %17 = math.exp %16 : vector<8x128xf32>
    %c0_9 = arith.constant 0 : index
    %c0_10 = arith.constant 0 : index
    %18 = vector.load %arg2[%c0_9, %c0_10] : memref<8x1024xbf16, #tpu.memory_space<vmem>>, vector<8x1024xbf16>
    %19 = arith.extf %18 : vector<8x1024xbf16> to vector<8x1024xf32>
    %20 = arith.mulf %19, %19 : vector<8x1024xf32>
    %cst_11 = arith.constant dense<0.000000e+00> : vector<8xf32>
    %21 = vector.multi_reduction <add>, %20, %cst_11 [1] : vector<8x1024xf32> to vector<8xf32>
    %22 = vector.shape_cast %21 : vector<8xf32> to vector<8x1xf32>
    %23 = math.sqrt %22 : vector<8x1xf32>
    %cst_12 = arith.constant 9.99999993E-9 : f32
    %24 = vector.broadcast %cst_12 : f32 to vector<8x1xf32>
    %25 = arith.addf %23, %24 : vector<8x1xf32>
    %26 = tpu.reciprocal %25 {approx = true} : vector<8x1xf32> -> vector<8x1xf32>
    %27 = vector.broadcast %26 : vector<8x1xf32> to vector<8x1024xf32>
    %28 = arith.mulf %19, %27 : vector<8x1024xf32>
    %29 = arith.truncf %28 : vector<8x1024xf32> to vector<8x1024xbf16>
    %cst_13 = arith.constant dense<0.000000e+00> : vector<8x128xf32>
    %30 = tpu.matmul %29, %1, %cst_13 {dimension_numbers = #tpu.dot_dimension_numbers<[1], [0], [0], [1], [0, 0, 1, 1], [], []>} : vector<8x1024xbf16>, vector<1024x128xbf16>, vector<8x128xf32> -> vector<8x128xf32>
    %cst_14 = arith.constant 1.000000e+01 : f32
    %31 = vector.broadcast %cst_14 : f32 to vector<8x128xf32>
    %32 = arith.mulf %31, %30 : vector<8x128xf32>
    %33 = arith.addf %6, %32 : vector<8x128xf32>
    %cst_15 = arith.constant dense<0xFF800000> : vector<8xf32>
    %34 = vector.multi_reduction <maximumf>, %33, %cst_15 [1] : vector<8x128xf32> to vector<8xf32>
    %35 = vector.shape_cast %34 : vector<8xf32> to vector<8x1xf32>
    %36 = vector.broadcast %35 : vector<8x1xf32> to vector<8x128xf32>
    %37 = arith.subf %33, %36 : vector<8x128xf32>
    %38 = math.exp %37 : vector<8x128xf32>
    %cst_16 = arith.constant dense<0.000000e+00> : vector<8xf32>
    %39 = vector.multi_reduction <add>, %38, %cst_16 [1] : vector<8x128xf32> to vector<8xf32>
    %40 = vector.shape_cast %39 : vector<8xf32> to vector<8x1xf32>
    %41 = math.log %40 : vector<8x1xf32>
    %42 = vector.broadcast %41 : vector<8x1xf32> to vector<8x128xf32>
    %43 = arith.subf %37, %42 : vector<8x128xf32>
    %44 = math.exp %43 : vector<8x128xf32>
    %45 = arith.subf %44, %17 : vector<8x128xf32>
    %cst_17 = arith.constant 5.000000e+00 : f32
    %46 = vector.broadcast %cst_17 : f32 to vector<8x128xf32>
    %47 = arith.mulf %45, %46 : vector<8x128xf32>
    %48 = arith.truncf %47 : vector<8x128xf32> to vector<8x128xbf16>
    %cst_18 = arith.constant dense<0.000000e+00> : vector<8x1024xf32>
    %49 = tpu.matmul %48, %2, %cst_18 {dimension_numbers = #tpu.dot_dimension_numbers<[1], [0], [0], [1], [0, 0, 1, 1], [], []>} : vector<8x128xbf16>, vector<128x1024xbf16>, vector<8x1024xf32> -> vector<8x1024xf32>
    %50 = arith.mulf %49, %49 : vector<8x1024xf32>
    %cst_19 = arith.constant dense<0.000000e+00> : vector<8xf32>
    %51 = vector.multi_reduction <add>, %50, %cst_19 [1] : vector<8x1024xf32> to vector<8xf32>
    %52 = vector.shape_cast %51 : vector<8xf32> to vector<8x1xf32>
    %53 = math.sqrt %52 : vector<8x1xf32>
    %cst_20 = arith.constant 9.99999993E-9 : f32
    %54 = vector.broadcast %cst_20 : f32 to vector<8x1xf32>
    %55 = arith.addf %53, %54 : vector<8x1xf32>
    %56 = tpu.reciprocal %55 {approx = true} : vector<8x1xf32> -> vector<8x1xf32>
    %57 = vector.broadcast %56 : vector<8x1xf32> to vector<8x1024xf32>
    %58 = arith.mulf %49, %57 : vector<8x1024xf32>
    %59 = arith.truncf %58 : vector<8x1024xf32> to vector<8x1024xbf16>
    %cst_21 = arith.constant dense<0.000000e+00> : vector<8x128xf32>
    %60 = tpu.matmul %59, %1, %cst_21 {dimension_numbers = #tpu.dot_dimension_numbers<[1], [0], [0], [1], [0, 0, 1, 1], [], []>} : vector<8x1024xbf16>, vector<1024x128xbf16>, vector<8x128xf32> -> vector<8x128xf32>
    %cst_22 = arith.constant 1.000000e+00 : f32
    %61 = vector.broadcast %cst_22 : f32 to vector<8x128xf32>
    %62 = arith.mulf %61, %60 : vector<8x128xf32>
    %63 = arith.addf %6, %62 : vector<8x128xf32>
    %cst_23 = arith.constant dense<0xFF800000> : vector<8xf32>
    %64 = vector.multi_reduction <maximumf>, %63, %cst_23 [1] : vector<8x128xf32> to vector<8xf32>
    %65 = vector.shape_cast %64 : vector<8xf32> to vector<8x1xf32>
    %66 = vector.broadcast %65 : vector<8x1xf32> to vector<8x128xf32>
    %67 = arith.subf %63, %66 : vector<8x128xf32>
    %68 = math.exp %67 : vector<8x128xf32>
    %cst_24 = arith.constant dense<0.000000e+00> : vector<8xf32>
    %69 = vector.multi_reduction <add>, %68, %cst_24 [1] : vector<8x128xf32> to vector<8xf32>
    %70 = vector.shape_cast %69 : vector<8xf32> to vector<8x1xf32>
    %71 = math.log %70 : vector<8x1xf32>
    %72 = vector.broadcast %71 : vector<8x1xf32> to vector<8x128xf32>
    %73 = arith.subf %67, %72 : vector<8x128xf32>
    %74 = arith.subf %16, %73 : vector<8x128xf32>
    %75 = arith.mulf %17, %74 : vector<8x128xf32>
    %76 = tpu.iota {dimensions = array<i32: 1>} : vector<8x128xi32>
    %77 = tpu.iota {dimensions = array<i32: 0>} : vector<8x128xi32>
    %c8_i32 = arith.constant 8 : i32
    %78 = arith.muli %arg0, %c8_i32 : i32
    %79 = vector.broadcast %78 : i32 to vector<8x128xi32>
    %80 = arith.addi %77, %79 : vector<8x128xi32>
    %c10_i32 = arith.constant 10 : i32
    %81 = vector.broadcast %c10_i32 : i32 to vector<8x128xi32>
    %82 = arith.cmpi slt, %76, %81 : vector<8x128xi32>
    %c2_i32 = arith.constant 2 : i32
    %83 = vector.broadcast %c2_i32 : i32 to vector<8x128xi32>
    %84 = arith.cmpi slt, %80, %83 : vector<8x128xi32>
    %85 = arith.andi %82, %84 : vector<8x128xi1>
    %cst_25 = arith.constant 0.000000e+00 : f32
    %86 = vector.broadcast %cst_25 : f32 to vector<8x128xf32>
    %87 = arith.select %85, %75, %86 : vector<8x128xi1>, vector<8x128xf32>
    %c0_26 = arith.constant 0 : index
    %c0_27 = arith.constant 0 : index
    %88 = vector.load %arg6[%c0_26, %c0_27] : memref<8x128xf32, #tpu.memory_space<vmem>>, vector<8x128xf32>
    tpu.vector_store %arg6[%c0_26, %c0_27], %87 {strides = array<i32>} : memref<8x128xf32, #tpu.memory_space<vmem>>, vector<8x128xf32>,
    return
  }
  func.func @transform_0(%arg0: i32) -> (i32, i32) {
    %c0_i32 = arith.constant 0 : i32
    %c0_i32_0 = arith.constant 0 : i32
    return %arg0, %c0_i32 : i32, i32
  }
  func.func @transform_1(%arg0: i32) -> (i32, i32) {
    %c0_i32 = arith.constant 0 : i32
    %c0_i32_0 = arith.constant 0 : i32
    return %arg0, %c0_i32 : i32, i32
  }
  func.func @transform_2(%arg0: i32) -> (i32, i32) {
    %c0_i32 = arith.constant 0 : i32
    %c0_i32_0 = arith.constant 0 : i32
    %c0_i32_1 = arith.constant 0 : i32
    return %c0_i32, %c0_i32_0 : i32, i32
  }
  func.func @transform_3(%arg0: i32) -> (i32, i32) {
    %c0_i32 = arith.constant 0 : i32
    %c0_i32_0 = arith.constant 0 : i32
    %c0_i32_1 = arith.constant 0 : i32
    return %c0_i32, %c0_i32_0 : i32, i32
  }
  func.func @transform_4(%arg0: i32) -> (i32, i32) {
    %c0_i32 = arith.constant 0 : i32
    %c0_i32_0 = arith.constant 0 : i32
    %c0_i32_1 = arith.constant 0 : i32
    return %c0_i32, %c0_i32_0 : i32, i32
  }
  func.func @transform_5(%arg0: i32) -> (i32, i32) {
    %c0_i32 = arith.constant 0 : i32
    %c0_i32_0 = arith.constant 0 : i32
    return %arg0, %c0_i32 : i32, i32
  }
}

</mosaic_0001>

<bundles_post_ra>
// kernel: tpu_custom_call.1
= control target key start
LH: loop header
LB: loop body
LE: loop exit
PB: predicated region body
PF: predicated region fallthrough
CT: control target
= control target key end

     0   :  { %10 = vsyncpa [#allocation3], 0  ;;  %s2959_s0 = inlined_call_operand.hbm [shape: bf16[8,1024], index: 0, kind: input, shape index: {}]   ;;  %s2960_s1 = inlined_call_operand.hbm [shape: bf16[8,1024], index: 1, kind: input, shape index: {}]   ;;  %s2961_s2 = inlined_call_operand.hbm [shape: bf16[1024,128], index: 2, kind: input, shape index: {}]   ;;  %s2962_s3 = inlined_call_operand.hbm [shape: bf16[128,1024], index: 3, kind: input, shape index: {}]   ;;  %s2963_s4 = inlined_call_operand.vmem [shape: f32[1,128], index: 4, kind: input, shape index: {}]   ;;  %s2964_s5 = inlined_call_operand.hbm [shape: f32[8,128], index: 5, kind: output, shape index: {}]  }
   0x1   :  { %11 = vsyncpa [#allocation6], 0 }
   0x2   :  { %12 = vsyncpa [#allocation9], 0 }
   0x3   :  { %13 = vsyncpa [#allocation4], 0  ;;  %s2508_s18 = smov [#allocation5]   ;;  %s2509_s20 = smov [#allocation2]  }
   0x4   :  { %s30_s19 = sshll.u32 %s2508_s18, 4  ;;  %s20_s21 = sshll.u32 %s2509_s20, 4  ;;  %s31_s19 = int_to_ptr.vmem [resolvable:$true] %s30_s19  ;;  %s21_s21 = int_to_ptr.vmem [resolvable:$true] %s20_s21 }
   0x5   :  { %s2390_s24 = scalar_lea.hbm %s2960_s1, 512 }
   0x6   :  { %p2391_p0 = scmp.ne.s32.totalorder %s2960_s1, %s2390_s24  ;;  %p2394_p1 = scmp.lt.u32.totalorder %s2390_s24, %s2960_s1 }
   0x8   :  { %p2396_p2 = pnand %p2394_p1, %p2391_p0 }
   0xa   :  { %2399 = shalt.err (!%p2396_p2)
}
   0xb   :  { %s2400_s29 = scalar_lea.vmem %s31_s19, 512  ;;  %p2405_p4 = scmp.lt.s32.totalorder %s31_s19, %s31_s19 }
   0xc   :  { %p2401_p3 = scmp.ne.s32.totalorder %s31_s19, %s2400_s29  ;;  %p2406_p5 = scmp.lt.s32.totalorder %s2400_s29, %s2400_s29 }
   0xe   :  { %p2407_p6 = por %p2406_p5, %p2405_p4 }
  0x10   :  { %p2408_p7 = pnand %p2407_p6, %p2401_p3 }
  0x12   :  { %2411 = shalt.err (!%p2408_p7)
}
  0x13   :  { %33 = dma.hbm_to_vmem [thread:$0]  %s2960_s1, 512, %s31_s19, [#allocation6]  }
  0x14   :  { %s2412_s9 = scalar_lea.hbm %s2959_s0, 512 }
  0x15   :  { %p2413_p8 = scmp.ne.s32.totalorder %s2959_s0, %s2412_s9  ;;  %p2416_p9 = scmp.lt.u32.totalorder %s2412_s9, %s2959_s0 }
  0x17   :  { %p2418_p10 = pnand %p2416_p9, %p2413_p8 }
  0x19   :  { %2421 = shalt.err (!%p2418_p10)
}
  0x1a   :  { %s2422_s14 = scalar_lea.vmem %s21_s21, 512  ;;  %p2427_p12 = scmp.lt.s32.totalorder %s21_s21, %s21_s21 }
  0x1b   :  { %p2423_p11 = scmp.ne.s32.totalorder %s21_s21, %s2422_s14  ;;  %p2428_p13 = scmp.lt.s32.totalorder %s2422_s14, %s2422_s14 }
  0x1d   :  { %p2429_p0 = por %p2428_p13, %p2427_p12 }
  0x1f   :  { %p2430_p1 = pnand %p2429_p0, %p2423_p11 }
  0x21   :  { %2433 = shalt.err (!%p2430_p1)
}
  0x22   :  { %23 = dma.hbm_to_vmem [thread:$0]  %s2959_s0, 512, %s21_s21, [#allocation3]  }
  0x23   :  { %s2510_s16 = smov [#allocation7]   ;;  %s2434_s20 = scalar_lea.hbm %s2961_s2, 8192 }
  0x24   :  { %s39_s17 = sshll.u32 %s2510_s16, 4  ;;  %p2435_p2 = scmp.ne.s32.totalorder %s2961_s2, %s2434_s20  ;;  %s40_s17 = int_to_ptr.vmem [resolvable:$true] %s39_s17 }
  0x25   :  { %p2438_p3 = scmp.lt.u32.totalorder %s2434_s20, %s2961_s2 }
  0x27   :  { %p2440_p4 = pnand %p2438_p3, %p2435_p2 }
  0x29   :  { %2443 = shalt.err (!%p2440_p4)
}
  0x2a   :  { %s2444_s26 = scalar_lea.vmem %s40_s17, 8192  ;;  %p2449_p6 = scmp.lt.s32.totalorder %s40_s17, %s40_s17 }
  0x2b   :  { %p2445_p5 = scmp.ne.s32.totalorder %s40_s17, %s2444_s26  ;;  %p2450_p7 = scmp.lt.s32.totalorder %s2444_s26, %s2444_s26 }
  0x2d   :  { %p2451_p8 = por %p2450_p7, %p2449_p6 }
  0x2f   :  { %p2452_p9 = pnand %p2451_p8, %p2445_p5 }
  0x31   :  { %2455 = shalt.err (!%p2452_p9)
}
  0x32   :  { %s2511_s0 = smov 64   ;;  %s2512_s21 = smov 4  }
  0x33   :  { %45 = dma.hbm_to_vmem [thread:$0]  %s2961_s2, 8192, %s40_s17, [#allocation6], %s2511_s0, %s2511_s0, %s2512_s21  }
  0x34   :  { %s2513_s29 = smov [#allocation8]   ;;  %s2456_s8 = scalar_lea.hbm %s2962_s3, 8192 }
  0x35   :  { %s51_s30 = sshll.u32 %s2513_s29, 4  ;;  %p2457_p10 = scmp.ne.s32.totalorder %s2962_s3, %s2456_s8  ;;  %s52_s30 = int_to_ptr.vmem [resolvable:$true] %s51_s30 }
  0x36   :  { %p2460_p11 = scmp.lt.u32.totalorder %s2456_s8, %s2962_s3 }
  0x38   :  { %p2462_p12 = pnand %p2460_p11, %p2457_p10 }
  0x3a   :  { %2465 = shalt.err (!%p2462_p12)
}
  0x3b   :  { %s2466_s13 = scalar_lea.vmem %s52_s30, 8192  ;;  %p2471_p0 = scmp.lt.s32.totalorder %s52_s30, %s52_s30 }
  0x3c   :  { %p2467_p13 = scmp.ne.s32.totalorder %s52_s30, %s2466_s13  ;;  %p2472_p1 = scmp.lt.s32.totalorder %s2466_s13, %s2466_s13 }
  0x3e   :  { %p2473_p2 = por %p2472_p1, %p2471_p0 }
  0x40   :  { %p2474_p3 = pnand %p2473_p2, %p2467_p13 }
  0x42   :  { %2477 = shalt.err (!%p2474_p3)
}
  0x43   :  { %s2514_s2 = smov 512   ;;  %s2515_s14 = smov 32  }
  0x44   :  { %57 = dma.hbm_to_vmem [thread:$0]  %s2962_s3, 8192, %s52_s30, [#allocation9], %s2514_s2, %s2514_s2, %s2515_s14  }
  0x45   :  { %2500 = dma.done.wait [#allocation3], 512  }
  0x46   :  { %2501 = vsyncadd [#allocation3], 4294966784 }
  0x47   :  { %2502 = dma.done.wait [#allocation6], 8704  }
  0x48   :  { %2503 = vsyncadd [#allocation6], 4294958592 }
  0x49   :  { %2504 = dma.done.wait [#allocation9], 8192  }
  0x4a   :  { %2505 = vsyncadd [#allocation9], 4294959104  ;;  %v2596_v0 = vld [vmem:[#allocation7 + $0x40] sm:$0xff]   ;;  %v2607_v4 = vld [vmem:[#allocation7 + $0x48] sm:$0xff]  }
  0x4b   :  { %v2598_v1 = vld [vmem:[#allocation7] sm:$0xff]   ;;  %1956 = vmatprep.subr.bf16.mxu0 %v2596_v0  ;;  %v2610_v5 = vld [vmem:[#allocation7 + $0x8] sm:$0xff]   ;;  %v2619_v8 = vld [vmem:[#allocation7 + $0x50] sm:$0xff]  }
  0x4c   :  { %v2601_v2 = vld [vmem:[#allocation7 + $0xc0] sm:$0xff]   ;;  %1957 = vmatpush3.bf16.msra.mxu0 %v2598_v1  ;;  %v2613_v6 = vld [vmem:[#allocation7 + $0xc8] sm:$0xff]   ;;  %v2622_v9 = vld [vmem:[#allocation7 + $0x10] sm:$0xff]  }
  0x4d   :  { %v2604_v3 = vld [vmem:[#allocation7 + $0x80] sm:$0xff]   ;;  %1978 = vmatprep.subr.bf16.mxu1 %v2601_v2  ;;  %1958 = vmatprep.subr.bf16.mxu0 %v2607_v4  ;;  %v2616_v7 = vld [vmem:[#allocation7 + $0x88] sm:$0xff]   ;;  %v2625_v10 = vld [vmem:[#allocation7 + $0xd0] sm:$0xff]  }
  0x4e   :  { %1979 = vmatpush3.bf16.msra.mxu1 %v2604_v3  ;;  %v2628_v11 = vld [vmem:[#allocation7 + $0x90] sm:$0xff]   ;;  %v2631_v12 = vld [vmem:[#allocation7 + $0x58] sm:$0xff]   ;;  %v860_v16 = vld [vmem:[#allocation5] sm:$0xff] }
  0x4f   :  { %1980 = vmatprep.subr.bf16.mxu1 %v2613_v6  ;;  %v2634_v13 = vld [vmem:[#allocation7 + $0x18] sm:$0xff]   ;;  %v861_v17 = vld [vmem:[#allocation5 + $0x8] sm:$0xff]  ;;  %v862_v18 = vld [vmem:[#allocation5 + $0x10] sm:$0xff]  ;;  %v2644_v19 = vunpack.c.l.bf16 %v860_v16  ;;  %v2646_v20 = vunpack.c.h.bf16 %v860_v16 }
  0x50   :  { %1959 = vmatpush3.bf16.msra.mxu0 %v2610_v5  ;;  %v2637_v14 = vld [vmem:[#allocation7 + $0xd8] sm:$0xff]   ;;  %v2648_v21 = vunpack.c.l.bf16 %v861_v17  ;;  %v2650_v22 = vunpack.c.h.bf16 %v861_v17  ;;  %v2652_v24 = vld [vmem:[#allocation7 + $0x60] sm:$0xff]   ;;  %v2654_v25 = vunpack.c.l.bf16 %v862_v18  ;;  %v2667_v31 = vunpack.c.h.bf16 %v862_v18  ;;  %v2675_v35 = vld [vmem:[#allocation7 + $0x68] sm:$0xff]  }
  0x51   :  { %1960 = vmatprep.subr.bf16.mxu0 %v2619_v8  ;;  %v2640_v15 = vld [vmem:[#allocation7 + $0x98] sm:$0xff]   ;;  %v872_v26 = vmul.f32 %v2644_v19, %v2644_v19  ;;  %v873_v27 = vmul.f32 %v2646_v20, %v2646_v20  ;;  %v2662_v29 = vld [vmem:[#allocation7 + $0x20] sm:$0xff]   ;;  %v2682_v39 = vld [vmem:[#allocation7 + $0x28] sm:$0xff]  }
  0x52   :  { %1981 = vmatpush3.bf16.msra.mxu1 %v2616_v7  ;;  %v863_v23 = vld [vmem:[#allocation5 + $0x18] sm:$0xff]  ;;  %2979 = vst [vmem:[#allocation15_spill] sm:$0xff] %v2654_v25  ;;  %v874_v28 = vmul.f32 %v2648_v21, %v2648_v21  ;;  %v2665_v30 = vld [vmem:[#allocation7 + $0xe0] sm:$0xff]   ;;  %v875_v32 = vmul.f32 %v2650_v22, %v2650_v22  ;;  %v876_v37 = vmul.f32 %v2654_v25, %v2654_v25  ;;  %v2685_v40 = vld [vmem:[#allocation7 + $0xe8] sm:$0xff]  }
  0x53   :  { %1982 = vmatprep.subr.bf16.mxu1 %v2625_v10  ;;  %v880_v33 = vadd.f32 %v873_v27, %v872_v26  ;;  %v2672_v34 = vld [vmem:[#allocation7 + $0xa0] sm:$0xff]   ;;  %v2677_v36 = vunpack.c.l.bf16 %v863_v23  ;;  %v2687_v41 = vunpack.c.h.bf16 %v863_v23  ;;  %v877_v42 = vmul.f32 %v2667_v31, %v2667_v31  ;;  %v2692_v44 = vld [vmem:[#allocation7 + $0xa8] sm:$0xff]   ;;  %v2695_v45 = vld [vmem:[#allocation7 + $0x70] sm:$0xff]  }
  0x54   :  { %1961 = vmatpush3.bf16.msra.mxu0 %v2622_v9  ;;  %v2700_v48 = vld [vmem:[#allocation7 + $0x30] sm:$0xff]   ;;  %v2711_v53 = vld [vmem:[#allocation7 + $0x78] sm:$0xff]   ;;  %v73_v59 = vld [vmem:[#allocation2] sm:$0xff] }
  0x55   :  { %1962 = vmatprep.subr.bf16.mxu0 %v2631_v12  ;;  %2980 = vst [vmem:[#allocation16_spill] sm:$0xff] %v2677_v36  ;;  %v881_v38 = vadd.f32 %v880_v33, %v874_v28  ;;  %v878_v46 = vmul.f32 %v2677_v36, %v2677_v36  ;;  %v2703_v49 = vld [vmem:[#allocation7 + $0xf0] sm:$0xff]   ;;  %v879_v50 = vmul.f32 %v2687_v41, %v2687_v41  ;;  %v2714_v55 = vld [vmem:[#allocation7 + $0x38] sm:$0xff]   ;;  %v2723_v62 = vld [vmem:[#allocation7 + $0x140] sm:$0xff]  }
  0x56   :  { %1983 = vmatpush3.bf16.msra.mxu1 %v2628_v11  ;;  %v2708_v52 = vld [vmem:[#allocation7 + $0xb0] sm:$0xff]   ;;  %v2717_v56 = vld [vmem:[#allocation7 + $0xf8] sm:$0xff]   ;;  %v1820_v60 = vcombine.low %v73_v59, %v73_v59  ;;  %v1821_v61 = vcombine.high %v73_v59, %v73_v59  ;;  %v2726_v63 = vld [vmem:[#allocation7 + $0x100] sm:$0xff]  }
  0x57   :  { %1984 = vmatprep.subr.bf16.mxu1 %v2637_v14  ;;  %v882_v43 = vadd.f32 %v881_v38, %v875_v32  ;;  %v2720_v58 = vld [vmem:[#allocation7 + $0xb8] sm:$0xff]   ;;  %v74_v16 = vld [vmem:[#allocation2 + $0x8] sm:$0xff]  ;;  %v2729_v23 = vld [vmem:[#allocation7 + $0x1c0] sm:$0xff]  }
  0x58   :  { %1963 = vmatpush3.bf16.msra.mxu0 %v2634_v13  ;;  %720 = vmatprep.mubr.bf16.mxu0 %v1821_v61  ;;  %v1822_v17 = vcombine.low %v74_v16, %v74_v16  ;;  %v1823_v18 = vcombine.high %v74_v16, %v74_v16  ;;  %v2731_v26 = vld [vmem:[#allocation7 + $0x180] sm:$0xff]   ;;  %v2734_v27 = vld [vmem:[#allocation7 + $0x148] sm:$0xff]   ;;  %v2749_v38 = vld [vmem:[#allocation7 + $0x110] sm:$0xff]  }
  0x59   :  { %1964 = vmatprep.subr.bf16.mxu0 %v2652_v24  ;;  %v883_v47 = vadd.f32 %v882_v43, %v876_v37  ;;  %v2737_v28 = vld [vmem:[#allocation7 + $0x108] sm:$0xff]   ;;  %v2747_v37 = vld [vmem:[#allocation7 + $0x150] sm:$0xff]   ;;  %v2777_v59 = vld [vmem:[#allocation7 + $0x1e0] sm:$0xff]  }
  0x5a   :  { %1985 = vmatpush3.bf16.msra.mxu1 %v2640_v15  ;;  %760 = vmatprep.mubr.bf16.mxu1 %v1823_v18  ;;  %v2741_v32 = vld [vmem:[#allocation7 + $0x1c8] sm:$0xff]   ;;  %v2755_v43 = vld [vmem:[#allocation7 + $0x190] sm:$0xff]   ;;  %2984 = vst [vmem:[#allocation20_spill] sm:$0xff] %v2777_v59 }
  0x5b   :  { %1986 = vmatprep.subr.bf16.mxu1 %v2665_v30  ;;  %v884_v51 = vadd.f32 %v883_v47, %v877_v42  ;;  %v2743_v33 = vld [vmem:[#allocation7 + $0x188] sm:$0xff]   ;;  %v2753_v42 = vld [vmem:[#allocation7 + $0x1d0] sm:$0xff]   ;;  %v2761_v47 = vld [vmem:[#allocation7 + $0x118] sm:$0xff]  }
  0x5c   :  { %1965 = vmatpush3.bf16.msra.mxu0 %v2662_v29  ;;  %v2783_v61 = vld [vmem:[#allocation7 + $0x168] sm:$0xff]   ;;  %v2795_v36 = vld [vmem:[#allocation7 + $0x170] sm:$0xff]  }
  0x5d   :  { %1966 = vmatprep.subr.bf16.mxu0 %v2675_v35  ;;  %v885_v54 = vadd.f32 %v884_v51, %v878_v46  ;;  %v2759_v46 = vld [vmem:[#allocation7 + $0x158] sm:$0xff]   ;;  %2986 = vst [vmem:[#allocation22_spill] sm:$0xff] %v2783_v61  ;;  %v2785_v16 = vld [vmem:[#allocation7 + $0x128] sm:$0xff]   ;;  %2990 = vst [vmem:[#allocation26_spill] sm:$0xff] %v2795_v36 }
  0x5e   :  { %1987 = vmatpush3.bf16.msra.mxu1 %v2672_v34  ;;  %v2767_v51 = vld [vmem:[#allocation7 + $0x198] sm:$0xff]   ;;  %2987 = vst [vmem:[#allocation23_spill] sm:$0xff] %v2785_v16  ;;  %v2791_v18 = vld [vmem:[#allocation7 + $0x1a8] sm:$0xff]   ;;  %v2797_v25 = vld [vmem:[#allocation7 + $0x130] sm:$0xff]  }
  0x5f   :  { %1988 = vmatprep.subr.bf16.mxu1 %v2685_v40  ;;  %v886_v57 = vadd.f32 %v885_v54, %v879_v50  ;;  %v2765_v50 = vld [vmem:[#allocation7 + $0x1d8] sm:$0xff]   ;;  %2981 = vst [vmem:[#allocation17_spill] sm:$0xff] %v2767_v51  ;;  %v2771_v54 = vld [vmem:[#allocation7 + $0x160] sm:$0xff]   ;;  %2989 = vst [vmem:[#allocation25_spill] sm:$0xff] %v2791_v18 }
  0x60   :  { %1967 = vmatpush3.bf16.msra.mxu0 %v2682_v39  ;;  %2982 = vst [vmem:[#allocation18_spill] sm:$0xff] %v2771_v54  ;;  %2991 = vst [vmem:[#allocation27_spill] sm:$0xff] %v2797_v25 }
  0x61   :  { %1968 = vmatprep.subr.bf16.mxu0 %v2695_v45  ;;  %887 = vadd.xlane.f32.xlu0 %v886_v57  ;;  %v2773_v57 = vld [vmem:[#allocation7 + $0x120] sm:$0xff]  }
  0x62   :  { %1989 = vmatpush3.bf16.msra.mxu1 %v2692_v44  ;;  %2983 = vst [vmem:[#allocation19_spill] sm:$0xff] %v2773_v57 }
  0x63   :  { %1990 = vmatprep.subr.bf16.mxu1 %v2703_v49 }
  0x64   :  { %1969 = vmatpush3.bf16.msra.mxu0 %v2700_v48 }
  0x65   :  { %1970 = vmatprep.subr.bf16.mxu0 %v2711_v53 }
  0x66   :  { %1991 = vmatpush3.bf16.msra.mxu1 %v2708_v52 }
  0x67   :  { %1992 = vmatprep.subr.bf16.mxu1 %v2717_v56 }
  0x68   :  { %1971 = vmatpush3.bf16.msra.mxu0 %v2714_v55 }
  0x69   :  { %2000 = vmatprep.subr.bf16.mxu0 %v2723_v62 }
  0x6a   :  { %1993 = vmatpush3.bf16.msra.mxu1 %v2720_v58 }
  0x6b   :  { %721 = vmatmul.mubr.bf16.vlgmr.msra.gmra.mrb[0].mxu0 %v1820_v60  ;;  %2022 = vmatprep.subr.bf16.mxu1 %v2729_v23  ;;  %v2779_v60 = vld [vmem:[#allocation7 + $0x1a0] sm:$0xff]  }
  0x6c   :  { %2001 = vmatpush3.bf16.msra.mxu0 %v2726_v63  ;;  %2985 = vst [vmem:[#allocation21_spill] sm:$0xff] %v2779_v60 }
  0x6d   :  { %761 = vmatmul.mubr.bf16.vlgmr.msra.gmra.mrb[0].mxu1 %v1822_v17  ;;  %2002 = vmatprep.subr.bf16.mxu0 %v2734_v27  ;;  %v2789_v17 = vld [vmem:[#allocation7 + $0x1e8] sm:$0xff]  }
  0x6e   :  { %2023 = vmatpush3.bf16.msra.mxu1 %v2731_v26  ;;  %2988 = vst [vmem:[#allocation24_spill] sm:$0xff] %v2789_v17 }
  0x6f   :  { %2024 = vmatprep.subr.bf16.mxu1 %v2741_v32 }
  0x70   :  { %2003 = vmatpush3.bf16.msra.mxu0 %v2737_v28 }
  0x71   :  { %2004 = vmatprep.subr.bf16.mxu0 %v2747_v37 }
  0x72   :  { %2025 = vmatpush3.bf16.msra.mxu1 %v2743_v33 }
  0x73   :  { %2026 = vmatprep.subr.bf16.mxu1 %v2753_v42 }
  0x74   :  { %2005 = vmatpush3.bf16.msra.mxu0 %v2749_v38 }
  0x75   :  { %2006 = vmatprep.subr.bf16.mxu0 %v2759_v46 }
  0x76   :  { %2027 = vmatpush3.bf16.msra.mxu1 %v2755_v43 }
  0x77   :  { %2028 = vmatprep.subr.bf16.mxu1 %v2765_v50 }
  0x78   :  { %2007 = vmatpush3.bf16.msra.mxu0 %v2761_v47 }
  0x79   :  { %2008 = vmatprep.subr.bf16.mxu0 %v2771_v54 }
  0x7a   :  { %2029 = vmatpush3.bf16.msra.mxu1 %v2767_v51 }
  0x7b   :  { %2030 = vmatprep.subr.bf16.mxu1 %v2777_v59 }
  0x7c   :  { %2009 = vmatpush3.bf16.msra.mxu0 %v2773_v57  ;;  %v2801_v57 = vld [vmem:[#allocation7 + $0x1f0] sm:$0xff]  }
  0x7d   :  { %2010 = vmatprep.subr.bf16.mxu0 %v2783_v61  ;;  %2992 = vst [vmem:[#allocation28_spill] sm:$0xff] %v2801_v57  ;;  %v2807_v61 = vld [vmem:[#allocation7 + $0x178] sm:$0xff]  }
  0x7e   :  { %2031 = vmatpush3.bf16.msra.mxu1 %v2779_v60  ;;  %v2803_v60 = vld [vmem:[#allocation7 + $0x1b0] sm:$0xff]  }
  0x7f   :  { %2032 = vmatprep.subr.bf16.mxu1 %v2789_v17  ;;  %v2813_v17 = vld [vmem:[#allocation7 + $0x1f8] sm:$0xff]  }
  0x80   :  { %2011 = vmatpush3.bf16.msra.mxu0 %v2785_v16  ;;  %v2809_v16 = vld [vmem:[#allocation7 + $0x138] sm:$0xff]  }
  0x81   :  { %2012 = vmatprep.subr.bf16.mxu0 %v2795_v36 }
  0x82   :  { %2033 = vmatpush3.bf16.msra.mxu1 %v2791_v18  ;;  %v75_v18 = vld [vmem:[#allocation2 + $0x10] sm:$0xff] }
  0x83   :  { %2034 = vmatprep.subr.bf16.mxu1 %v2801_v57  ;;  %v1824_v36 = vcombine.low %v75_v18, %v75_v18  ;;  %v1825_v59 = vcombine.high %v75_v18, %v75_v18  ;;  %v76_v57 = vld [vmem:[#allocation2 + $0x18] sm:$0xff] }
  0x84   :  { %2013 = vmatpush3.bf16.msra.mxu0 %v2797_v25  ;;  %v2817_v25 = vld [vmem:[#allocation7 + $0x1b8] sm:$0xff]   ;;  %v1826_v54 = vcombine.low %v76_v57, %v76_v57  ;;  %v1827_v51 = vcombine.high %v76_v57, %v76_v57 }
  0x85   :  { %2014 = vmatprep.subr.bf16.mxu0 %v2807_v61  ;;  %800 = vmatprep.mubr.bf16.mxu0 %v1825_v59 }
  0x86   :  { %2035 = vmatpush3.bf16.msra.mxu1 %v2803_v60  ;;  %840 = vmatprep.mubr.bf16.mxu1 %v1827_v51 }
  0x87   :  { %2036 = vmatprep.subr.bf16.mxu1 %v2813_v17 }
  0x88   :  { %2015 = vmatpush3.bf16.msra.mxu0 %v2809_v16 }
  0x89   :  { %2044 = vmatprep.subr.bf16.mxu0 %v2596_v0 }
  0x8a   :  { %2037 = vmatpush3.bf16.msra.mxu1 %v2817_v25 }
  0x8b   :  { %801 = vmatmul.mubr.bf16.vlgmr.msra.gmra.mrb[4].mxu0 %v1824_v36  ;;  %2066 = vmatprep.subr.bf16.mxu1 %v2601_v2  ;;  %v2999_v36 = vld [vmem:[#allocation24_spill] sm:$0xff] }
  0x8c   :  { %2045 = vmatpush3.bf16.msra.mxu0 %v2598_v1 }
  0x8d   :  { %841 = vmatmul.mubr.bf16.vlgmr.msra.gmra.mrb[4].mxu1 %v1826_v54  ;;  %2046 = vmatprep.subr.bf16.mxu0 %v2607_v4 }
  0x8e   :  { %2067 = vmatpush3.bf16.msra.mxu1 %v2604_v3 }
  0x8f   :  { %2068 = vmatprep.subr.bf16.mxu1 %v2613_v6 }
  0x90   :  { %2047 = vmatpush3.bf16.msra.mxu0 %v2610_v5 }
  0x91   :  { %2048 = vmatprep.subr.bf16.mxu0 %v2619_v8 }
  0x92   :  { %2069 = vmatpush3.bf16.msra.mxu1 %v2616_v7 }
  0x93   :  { %2070 = vmatprep.subr.bf16.mxu1 %v2625_v10 }
  0x94   :  { %2049 = vmatpush3.bf16.msra.mxu0 %v2622_v9 }
  0x95   :  { %2050 = vmatprep.subr.bf16.mxu0 %v2631_v12 }
  0x96   :  { %2071 = vmatpush3.bf16.msra.mxu1 %v2628_v11 }
  0x97   :  { %2072 = vmatprep.subr.bf16.mxu1 %v2637_v14 }
  0x98   :  { %2051 = vmatpush3.bf16.msra.mxu0 %v2634_v13 }
  0x99   :  { %2052 = vmatprep.subr.bf16.mxu0 %v2652_v24 }
  0x9a   :  { %2073 = vmatpush3.bf16.msra.mxu1 %v2640_v15 }
  0x9b   :  { %2074 = vmatprep.subr.bf16.mxu1 %v2665_v30 }
  0x9c   :  { %2053 = vmatpush3.bf16.msra.mxu0 %v2662_v29 }
  0x9d   :  { %2054 = vmatprep.subr.bf16.mxu0 %v2675_v35  ;;  %v2998_v35 = vld [vmem:[#allocation22_spill] sm:$0xff] }
  0x9e   :  { %2075 = vmatpush3.bf16.msra.mxu1 %v2672_v34  ;;  %v2997_v34 = vld [vmem:[#allocation21_spill] sm:$0xff] }
  0x9f   :  { %2076 = vmatprep.subr.bf16.mxu1 %v2685_v40  ;;  %v3001_v40 = vld [vmem:[#allocation25_spill] sm:$0xff] }
  0xa0   :  { %2055 = vmatpush3.bf16.msra.mxu0 %v2682_v39  ;;  %v3000_v39 = vld [vmem:[#allocation23_spill] sm:$0xff] }
  0xa1   :  { %2056 = vmatprep.subr.bf16.mxu0 %v2695_v45  ;;  %v3004_v45 = vld [vmem:[#allocation27_spill] sm:$0xff] }
  0xa2   :  { %2077 = vmatpush3.bf16.msra.mxu1 %v2692_v44  ;;  %v3003_v44 = vld [vmem:[#allocation28_spill] sm:$0xff] }
  0xa3   :  { %2078 = vmatprep.subr.bf16.mxu1 %v2703_v49 }
  0xa4   :  { %2057 = vmatpush3.bf16.msra.mxu0 %v2700_v48  ;;  %v3005_v48 = vld [vmem:[#allocation15_spill] sm:$0xff] }
  0xa5   :  { %2058 = vmatprep.subr.bf16.mxu0 %v2711_v53 }
  0xa6   :  { %2079 = vmatpush3.bf16.msra.mxu1 %v2708_v52  ;;  %v3006_v52 = vld [vmem:[#allocation16_spill] sm:$0xff] }
  0xa7   :  { %2080 = vmatprep.subr.bf16.mxu1 %v2717_v56 }
  0xa8   :  { %2059 = vmatpush3.bf16.msra.mxu0 %v2714_v55 }
  0xa9   :  { %2088 = vmatprep.subr.bf16.mxu0 %v2723_v62  ;;  %v1819_v62 = vld [vmem:[%s2963_s4] ss:$0 sm:$0xff]  ;;  %s2517_s4 = smov [#allocation10]  }
  0xaa   :  { %2081 = vmatpush3.bf16.msra.mxu1 %v2720_v58  ;;  %s1808_s17 = sshll.u32 %s2517_s4, 4  ;;  %s1809_s17 = int_to_ptr.vmem [resolvable:$true] %s1808_s17 }
  0xab   :  { %2110 = vmatprep.subr.bf16.mxu1 %v2729_v23  ;;  %s2478_s18 = scalar_lea.vmem %s1809_s17, 128  ;;  %p2483_p5 = scmp.lt.s32.totalorder %s1809_s17, %s1809_s17 }
  0xac   :  { %p2479_p4 = scmp.ne.s32.totalorder %s1809_s17, %s2478_s18  ;;  %p2484_p6 = scmp.lt.s32.totalorder %s2478_s18, %s2478_s18 }
  0xae   :  { %p2485_p7 = por %p2484_p6, %p2483_p5 }
  0xb0   :  { %p2486_p8 = pnand %p2485_p7, %p2479_p4 }
  0xee   :  { %v888_v0 = vpop.xlane.xlu0 %887 }
  0xef   :  { %2302 = vrsqrt.f32 %v888_v0  ;;  %vm891_vm0 = vcmp.eq.f32.partialorder %v888_v0, inf  ;;  %v894_v3 = vand.u32 2147483648, %v888_v0  ;;  %vm893_vm1 = vcmp.eq.f32.partialorder %v888_v0, 0.0 }
  0xf9   :  { %v2303_v1 = vpop.eup %2302 }
  0xfa   :  { %v890_v2 = vmul.f32 %v2303_v1, %v888_v0 }
  0xfc   :  { %v892_v4 = vsel %vm891_vm0, %v888_v0, %v890_v2 }
  0xfd   :  { %v895_v5 = vsel %vm893_vm1, %v894_v3, %v892_v4 }
  0xfe   :  { %v896_v6 = vadd.f32 1e-08, %v895_v5 }
 0x100   :  { %2304 = vrcp.f32 %v896_v6 }
 0x10a   :  { %v2305_v7 = vpop.eup %2304 }
 0x10b   :  { %v899_v8 = vmul.f32 %v2305_v7, %v2646_v20  ;;  %v901_v9 = vmul.f32 %v2305_v7, %v2650_v22  ;;  %v898_v10 = vmul.f32 %v2305_v7, %v2644_v19  ;;  %v900_v11 = vmul.f32 %v2305_v7, %v2648_v21  ;;  %v2993_v19 = vld [vmem:[#allocation17_spill] sm:$0xff]  ;;  %v2994_v21 = vld [vmem:[#allocation18_spill] sm:$0xff]  ;;  %v2995_v22 = vld [vmem:[#allocation20_spill] sm:$0xff] }
 0x10c   :  { %v903_v12 = vmul.f32 %v2305_v7, %v2667_v31  ;;  %v905_v13 = vmul.f32 %v2305_v7, %v2687_v41  ;;  %v2996_v31 = vld [vmem:[#allocation19_spill] sm:$0xff]  ;;  %v3002_v41 = vld [vmem:[#allocation26_spill] sm:$0xff]  ;;  %v902_v49 = vmul.f32 %v2305_v7, %v3005_v48  ;;  %v904_v53 = vmul.f32 %v2305_v7, %v3006_v52 }
 0x10d   :  { %v907_v14 = vpack.c.bf16 %v899_v8, %v899_v8  ;;  %v909_v15 = vpack.c.bf16 %v901_v9, %v901_v9  ;;  %v906_v24 = vpack.c.bf16 %v898_v10, %v898_v10  ;;  %v908_v29 = vpack.c.bf16 %v900_v11, %v900_v11  ;;  %v205_v48 = vld [vmem:[#allocation8] sm:$0xff]  ;;  %v206_v52 = vld [vmem:[#allocation8 + $0x8] sm:$0xff] }
 0x10e   :  { %v911_v30 = vpack.c.bf16 %v903_v12, %v903_v12  ;;  %v913_v20 = vpack.c.bf16 %v905_v13, %v905_v13  ;;  %v910_v55 = vpack.c.bf16 %v902_v49, %v902_v49  ;;  %v912_v56 = vpack.c.bf16 %v904_v53, %v904_v53  ;;  %v209_v49 = vld [vmem:[#allocation8 + $0x20] sm:$0xff] }
 0x10f   :  { %946 = vmatprep.mubr.bf16.mxu0 %v907_v14  ;;  %986 = vmatprep.mubr.bf16.mxu1 %v909_v15  ;;  %v1893_v53 = vcombine.high %v205_v48, %v209_v49 }
 0x110   :  { %947 = vmatmul.mubr.bf16.vlgmr.msra.gmra.mrb[8].mxu0 %v906_v24  ;;  %987 = vmatmul.mubr.bf16.vlgmr.msra.gmra.mrb[8].mxu1 %v908_v29 }
 0x111   :  { %2089 = vmatpush3.bf16.msra.mxu0 %v2726_v63  ;;  %2111 = vmatpush3.bf16.msra.mxu1 %v2731_v26 }
 0x112   :  { %1026 = vmatprep.mubr.bf16.mxu0 %v911_v30  ;;  %1066 = vmatprep.mubr.bf16.mxu1 %v913_v20 }
 0x113   :  { %2090 = vmatprep.subr.bf16.mxu0 %v2734_v27  ;;  %2112 = vmatprep.subr.bf16.mxu1 %v2741_v32 }
 0x115   :  { %2091 = vmatpush3.bf16.msra.mxu0 %v2737_v28  ;;  %2113 = vmatpush3.bf16.msra.mxu1 %v2743_v33 }
 0x116   :  { %2092 = vmatprep.subr.bf16.mxu0 %v2747_v37  ;;  %2114 = vmatprep.subr.bf16.mxu1 %v2753_v42 }
 0x119   :  { %2093 = vmatpush3.bf16.msra.mxu0 %v2749_v38  ;;  %2115 = vmatpush3.bf16.msra.mxu1 %v2755_v43 }
 0x11a   :  { %2094 = vmatprep.subr.bf16.mxu0 %v2759_v46  ;;  %2116 = vmatprep.subr.bf16.mxu1 %v2765_v50 }
 0x11d   :  { %2095 = vmatpush3.bf16.msra.mxu0 %v2761_v47  ;;  %2117 = vmatpush3.bf16.msra.mxu1 %v2993_v19 }
 0x11e   :  { %2096 = vmatprep.subr.bf16.mxu0 %v2994_v21  ;;  %2118 = vmatprep.subr.bf16.mxu1 %v2995_v22 }
 0x121   :  { %2097 = vmatpush3.bf16.msra.mxu0 %v2996_v31  ;;  %2119 = vmatpush3.bf16.msra.mxu1 %v2997_v34 }
 0x122   :  { %2098 = vmatprep.subr.bf16.mxu0 %v2998_v35  ;;  %2120 = vmatprep.subr.bf16.mxu1 %v2999_v36 }
 0x125   :  { %2099 = vmatpush3.bf16.msra.mxu0 %v3000_v39  ;;  %2121 = vmatpush3.bf16.msra.mxu1 %v3001_v40 }
 0x126   :  { %2100 = vmatprep.subr.bf16.mxu0 %v3002_v41  ;;  %2122 = vmatprep.subr.bf16.mxu1 %v3003_v44 }
 0x129   :  { %2101 = vmatpush3.bf16.msra.mxu0 %v3004_v45  ;;  %2123 = vmatpush3.bf16.msra.mxu1 %v2803_v60 }
 0x12a   :  { %2102 = vmatprep.subr.bf16.mxu0 %v2807_v61  ;;  %2124 = vmatprep.subr.bf16.mxu1 %v2813_v17 }
 0x12d   :  { %2103 = vmatpush3.bf16.msra.mxu0 %v2809_v16  ;;  %2125 = vmatpush3.bf16.msra.mxu1 %v2817_v25 }
 0x12e   :  { %1411 = vmatprep.subr.bf16.mxu0 %v1893_v53 }
 0x130   :  { %1027 = vmatmul.mubr.bf16.vlgmr.msra.gmra.mrb[12].mxu0 %v910_v55  ;;  %1067 = vmatmul.mubr.bf16.vlgmr.msra.gmra.mrb[12].mxu1 %v912_v56  ;;  %v210_v55 = vld [vmem:[#allocation8 + $0x28] sm:$0xff]  ;;  %v1892_v56 = vcombine.low %v205_v48, %v209_v49 }
 0x131   :  { %v266_v48 = vld [vmem:[#allocation8 + $0x1e8] sm:$0xff] }
 0x132   :  { %1412 = vmatpush1.bf16.msra.mxu0 %v1892_v56 }
 0x13e   :  { %v1972_v58 = vpop.f32.mrb[0].mxu0 }
 0x13f   :  { %v1973_v63 = vpop.f32.mrb[1].mxu0 }
 0x140   :  { %v1974_v23 = vadd.f32 %v1973_v63, %v1972_v58  ;;  %v1975_v26 = vpop.f32.mrb[2].mxu0  ;;  %v1994_v27 = vpop.f32.mrb[0].mxu1  ;;  %v1894_v58 = vcombine.low %v206_v52, %v210_v55  ;;  %v213_v63 = vld [vmem:[#allocation8 + $0x40] sm:$0xff] }
 0x141   :  { %v1976_v28 = vpop.f32.mrb[3].mxu0  ;;  %v1995_v32 = vpop.f32.mrb[1].mxu1  ;;  %v214_v26 = vld [vmem:[#allocation8 + $0x48] sm:$0xff] }
 0x142   :  { %v723_v33 = vadd.f32 %v1974_v23, %v1819_v62  ;;  %v1996_v37 = vadd.f32 %v1995_v32, %v1994_v27  ;;  %v1997_v38 = vpop.f32.mrb[2].mxu1  ;;  %v1895_v62 = vcombine.high %v206_v52, %v210_v55  ;;  %v217_v23 = vld [vmem:[#allocation8 + $0x60] sm:$0xff]  ;;  %v218_v28 = vld [vmem:[#allocation8 + $0x68] sm:$0xff]  ;;  %v212_v52 = vld [vmem:[#allocation8 + $0x38] sm:$0xff] }
 0x143   :  { %v1998_v42 = vpop.f32.mrb[3].mxu1  ;;  %v1901_v27 = vcombine.high %v213_v63, %v217_v23  ;;  %v1900_v32 = vcombine.low %v213_v63, %v217_v23  ;;  %v221_v38 = vld [vmem:[#allocation8 + $0x80] sm:$0xff] }
 0x144   :  { %v763_v25 = vadd.f32 %v1996_v37, %v723_v33  ;;  %1452 = vmatprep.subr.bf16.mxu1 %v1895_v62  ;;  %v1902_v33 = vcombine.low %v214_v26, %v218_v28  ;;  %v1903_v37 = vcombine.high %v214_v26, %v218_v28  ;;  %v225_v42 = vld [vmem:[#allocation8 + $0xa0] sm:$0xff] }
 0x145   :  { %1453 = vmatpush1.bf16.msra.mxu1 %v1894_v58  ;;  %1413 = vmatprep.subr.bf16.mxu0 %v1901_v27 }
 0x146   :  { %1454 = vmatprep.subr.bf16.mxu1 %v1903_v37  ;;  %1414 = vmatpush1.bf16.msra.mxu0 %v1900_v32 }
 0x149   :  { %1455 = vmatpush1.bf16.msra.mxu1 %v1902_v33 }
 0x15e   :  { %v2016_v43 = vpop.f32.mrb[4].mxu0 }
 0x15f   :  { %v2017_v46 = vpop.f32.mrb[5].mxu0 }
 0x160   :  { %v2018_v47 = vadd.f32 %v2017_v46, %v2016_v43  ;;  %v2038_v50 = vpop.f32.mrb[4].mxu1  ;;  %v2019_v51 = vpop.f32.mrb[6].mxu0  ;;  %v1909_v43 = vcombine.high %v221_v38, %v225_v42  ;;  %v226_v46 = vld [vmem:[#allocation8 + $0xa8] sm:$0xff] }
 0x161   :  { %v2039_v54 = vpop.f32.mrb[5].mxu1  ;;  %v2020_v57 = vpop.f32.mrb[7].mxu0 }
 0x162   :  { %v803_v59 = vadd.f32 %v2018_v47, %v763_v25  ;;  %v2040_v60 = vadd.f32 %v2039_v54, %v2038_v50  ;;  %v2041_v61 = vpop.f32.mrb[6].mxu1  ;;  %v222_v25 = vld [vmem:[#allocation8 + $0x88] sm:$0xff]  ;;  %v1908_v47 = vcombine.low %v221_v38, %v225_v42  ;;  %1415 = vmatprep.subr.bf16.mxu0 %v1909_v43  ;;  %v229_v54 = vld [vmem:[#allocation8 + $0xc0] sm:$0xff] }
 0x163   :  { %v2042_v16 = vpop.f32.mrb[7].mxu1  ;;  %v1910_v50 = vcombine.low %v222_v25, %v226_v46  ;;  %v1911_v51 = vcombine.high %v222_v25, %v226_v46  ;;  %v233_v57 = vld [vmem:[#allocation8 + $0xe0] sm:$0xff]  ;;  %v234_v61 = vld [vmem:[#allocation8 + $0xe8] sm:$0xff] }
 0x164   :  { %v2895_v17 = vadd.f32 %v2040_v60, %v803_v59  ;;  %1416 = vmatpush1.bf16.msra.mxu0 %v1908_v47  ;;  %v230_v59 = vld [vmem:[#allocation8 + $0xc8] sm:$0xff]  ;;  %v1917_v60 = vcombine.high %v229_v54, %v233_v57  ;;  %v1916_v16 = vcombine.low %v229_v54, %v233_v57  ;;  %v215_v57 = vld [vmem:[#allocation8 + $0x50] sm:$0xff] }
 0x165   :  { %1456 = vmatprep.subr.bf16.mxu1 %v1911_v51 }
 0x166   :  { %848 = vmax.xlane.f32.xlu0 %v2895_v17  ;;  %1457 = vmatpush1.bf16.msra.mxu1 %v1910_v50 }
 0x167   :  { %1417 = vmatprep.subr.bf16.mxu0 %v1917_v60  ;;  %v216_v60 = vld [vmem:[#allocation8 + $0x58] sm:$0xff] }
 0x168   :  { %1418 = vmatpush1.bf16.msra.mxu0 %v1916_v16 }
 0x1e3   :  { %v2060_v18 = vpop.f32.mrb[8].mxu0  ;;  %v2082_v0 = vpop.f32.mrb[8].mxu1 }
 0x1e4   :  { %v2061_v1 = vpop.f32.mrb[9].mxu0  ;;  %v2083_v2 = vpop.f32.mrb[9].mxu1 }
 0x1e5   :  { %v2062_v3 = vadd.f32 %v2061_v1, %v2060_v18  ;;  %v2084_v4 = vadd.f32 %v2083_v2, %v2082_v0  ;;  %v2063_v5 = vpop.f32.mrb[10].mxu0  ;;  %v2085_v6 = vpop.f32.mrb[10].mxu1  ;;  %v1918_v18 = vcombine.low %v230_v59, %v234_v61  ;;  %v1919_v0 = vcombine.high %v230_v59, %v234_v61  ;;  %v237_v1 = vld [vmem:[#allocation8 + $0x100] sm:$0xff]  ;;  %v219_v59 = vld [vmem:[#allocation8 + $0x70] sm:$0xff]  ;;  %v220_v61 = vld [vmem:[#allocation8 + $0x78] sm:$0xff] }
 0x1e6   :  { %v2064_v7 = vpop.f32.mrb[11].mxu0  ;;  %v2086_v8 = vpop.f32.mrb[11].mxu1  ;;  %v241_v2 = vld [vmem:[#allocation8 + $0x120] sm:$0xff]  ;;  %v242_v5 = vld [vmem:[#allocation8 + $0x128] sm:$0xff] }
 0x1e7   :  { %v989_v9 = vadd.f32 %v2084_v4, %v2062_v3  ;;  %1458 = vmatprep.subr.bf16.mxu1 %v1919_v0  ;;  %v238_v3 = vld [vmem:[#allocation8 + $0x108] sm:$0xff]  ;;  %v1925_v4 = vcombine.high %v237_v1, %v241_v2  ;;  %v1924_v6 = vcombine.low %v237_v1, %v241_v2  ;;  %v1907_v0 = vcombine.high %v216_v60, %v220_v61  ;;  %v223_v1 = vld [vmem:[#allocation8 + $0x90] sm:$0xff] }
 0x1e8   :  { %1459 = vmatpush1.bf16.msra.mxu1 %v1918_v18  ;;  %v1926_v7 = vcombine.low %v238_v3, %v242_v5  ;;  %v1927_v8 = vcombine.high %v238_v3, %v242_v5  ;;  %v1905_v18 = vcombine.high %v215_v57, %v219_v59  ;;  %v227_v2 = vld [vmem:[#allocation8 + $0xb0] sm:$0xff]  ;;  %v228_v3 = vld [vmem:[#allocation8 + $0xb8] sm:$0xff]  ;;  %v1906_v5 = vcombine.low %v216_v60, %v220_v61  ;;  %v2331_v60 = vld [vmem:[#allocation7 + $0xc8] sm:$0xff]  }
 0x1e9   :  { %1419 = vmatprep.subr.bf16.mxu0 %v1925_v4  ;;  %v1904_v4 = vcombine.low %v215_v57, %v219_v59  ;;  %v2329_v57 = vld [vmem:[#allocation7 + $0x80] sm:$0xff]   ;;  %v2330_v59 = vld [vmem:[#allocation7 + $0x48] sm:$0xff]  }
 0x1ea   :  { %1460 = vmatprep.subr.bf16.mxu1 %v1927_v8  ;;  %1420 = vmatpush1.bf16.msra.mxu0 %v1924_v6  ;;  %v1913_v6 = vcombine.high %v223_v1, %v227_v2  ;;  %v231_v8 = vld [vmem:[#allocation8 + $0xd0] sm:$0xff]  ;;  %v2332_v61 = vld [vmem:[#allocation7 + $0x8] sm:$0xff]  }
 0x1ec   :  { %1461 = vmatpush1.bf16.msra.mxu1 %v1926_v7 }
 0x1f3   :  { %v849_v10 = vpop.xlane.xlu0 %848 }
 0x1f4   :  { %v2899_v11 = vsub.f32 %v2895_v17, %v849_v10  ;;  %v249_v10 = vld [vmem:[#allocation8 + $0x160] sm:$0xff] }
 0x1f6   :  { %v851_v14 = vmul.f32 1.442695, %v2899_v11 }
 0x1f8   :  { %2306 = vpow2.f32 %v851_v14  ;;  %v250_v14 = vld [vmem:[#allocation8 + $0x168] sm:$0xff] }
 0x202   :  { %v2307_v39 = vpop.eup %2306 }
 0x203   :  { %v2104_v12 = vpop.f32.mrb[12].mxu0  ;;  %v2126_v13 = vpop.f32.mrb[12].mxu1 }
 0x204   :  { %v2105_v15 = vpop.f32.mrb[13].mxu0  ;;  %v2127_v24 = vpop.f32.mrb[13].mxu1 }
 0x205   :  { %v2106_v29 = vadd.f32 %v2105_v15, %v2104_v12  ;;  %v2128_v30 = vadd.f32 %v2127_v24, %v2126_v13  ;;  %v2107_v20 = vpop.f32.mrb[14].mxu0  ;;  %v2129_v19 = vpop.f32.mrb[14].mxu1  ;;  %v246_v12 = vld [vmem:[#allocation8 + $0x148] sm:$0xff]  ;;  %v253_v15 = vld [vmem:[#allocation8 + $0x180] sm:$0xff] }
 0x206   :  { %v2108_v21 = vpop.f32.mrb[15].mxu0  ;;  %v2130_v22 = vpop.f32.mrb[15].mxu1  ;;  %v257_v24 = vld [vmem:[#allocation8 + $0x1a0] sm:$0xff]  ;;  %v1935_v20 = vcombine.high %v246_v12, %v250_v14  ;;  %v254_v19 = vld [vmem:[#allocation8 + $0x188] sm:$0xff] }
 0x207   :  { %v1029_v31 = vadd.f32 %v2106_v29, %v989_v9  ;;  %v245_v9 = vld [vmem:[#allocation8 + $0x140] sm:$0xff]  ;;  %v2516_v29 = vmov 0   ;;  %v258_v21 = vld [vmem:[#allocation8 + $0x1a8] sm:$0xff]  ;;  %v1934_v22 = vcombine.low %v246_v12, %v250_v14  ;;  %v1940_v53 = vcombine.low %v253_v15, %v257_v24  ;;  %v236_v12 = vld [vmem:[#allocation8 + $0xf8] sm:$0xff] }
 0x208   :  { %v1933_v13 = vcombine.high %v245_v9, %v249_v10  ;;  %1443 = vmatprep.mubr.bf16.mxu0 %v2516_v29  ;;  %1462 = vmatprep.subr.bf16.mxu1 %v1935_v20  ;;  %v1942_v56 = vcombine.low %v254_v19, %v258_v21  ;;  %v243_v20 = vld [vmem:[#allocation8 + $0x130] sm:$0xff] }
 0x209   :  { %v1069_v34 = vadd.f32 %v2128_v30, %v1029_v31  ;;  %v1932_v30 = vcombine.low %v245_v9, %v249_v10  ;;  %v1941_v31 = vcombine.high %v253_v15, %v257_v24  ;;  %1484 = vmatprep.mubr.bf16.mxu1 %v2516_v29  ;;  %1463 = vmatpush1.bf16.msra.mxu1 %v1934_v22  ;;  %v235_v9 = vld [vmem:[#allocation8 + $0xf0] sm:$0xff]  ;;  %v232_v10 = vld [vmem:[#allocation8 + $0xd8] sm:$0xff] }
 0x20a   :  { %1421 = vmatprep.subr.bf16.mxu0 %v1933_v13  ;;  %v1912_v13 = vcombine.low %v223_v1, %v227_v2  ;;  %v1921_v15 = vcombine.high %v231_v8, %v235_v9  ;;  %v1923_v24 = vcombine.high %v232_v10, %v236_v12  ;;  %v1920_v22 = vcombine.low %v231_v8, %v235_v9  ;;  %v2336_v1 = vld [vmem:[#allocation7 + $0x10] sm:$0xff]   ;;  %v2345_v8 = vld [vmem:[#allocation7 + $0xa0] sm:$0xff]   ;;  %v2346_v9 = vld [vmem:[#allocation7 + $0x68] sm:$0xff]  }
 0x20b   :  { %v1074_v35 = vmul.f32 10.0, %v1069_v34  ;;  %v261_v34 = vld [vmem:[#allocation8 + $0x1c0] sm:$0xff]  ;;  %1422 = vmatpush1.bf16.msra.mxu0 %v1932_v30  ;;  %v239_v30 = vld [vmem:[#allocation8 + $0x110] sm:$0xff] }
 0x20c   :  { %1423 = vmatprep.subr.bf16.mxu0 %v1941_v31  ;;  %v1922_v31 = vcombine.low %v232_v10, %v236_v12  ;;  %v2337_v2 = vld [vmem:[#allocation7 + $0x90] sm:$0xff]   ;;  %v2347_v10 = vld [vmem:[#allocation7 + $0xe8] sm:$0xff]  }
 0x20d   :  { %v1075_v36 = vadd.f32 %v1074_v35, %v2895_v17  ;;  %v265_v35 = vld [vmem:[#allocation8 + $0x1e0] sm:$0xff]  ;;  %v2348_v12 = vld [vmem:[#allocation7 + $0x28] sm:$0xff]  }
 0x20e   :  { %v1949_v58 = vcombine.high %v261_v34, %v265_v35  ;;  %v1948_v63 = vcombine.low %v261_v34, %v265_v35  ;;  %v1929_v34 = vcombine.high %v239_v30, %v243_v20  ;;  %v247_v35 = vld [vmem:[#allocation8 + $0x150] sm:$0xff] }
 0x20f   :  { %1076 = vmax.xlane.f32.xlu1 %v1075_v36  ;;  %1424 = vmatpush1.bf16.msra.mxu0 %v1940_v53  ;;  %v259_v53 = vld [vmem:[#allocation8 + $0x1b0] sm:$0xff] }
 0x210   :  { %1425 = vmatprep.subr.bf16.mxu0 %v1949_v58 }
 0x213   :  { %853 = vadd.xlane.f32.xlu1 %v2307_v39  ;;  %v207_v39 = vld [vmem:[#allocation8 + $0x10] sm:$0xff]  ;;  %1426 = vmatpush1.bf16.msra.mxu0 %v1948_v63 }
 0x29c   :  { %v1077_v40 = vpop.xlane.xlu1 %1076 }
 0x29d   :  { %v2903_v41 = vsub.f32 %v1075_v36, %v1077_v40  ;;  %v1943_v36 = vcombine.high %v254_v19, %v258_v21  ;;  %v211_v40 = vld [vmem:[#allocation8 + $0x30] sm:$0xff]  ;;  %v240_v19 = vld [vmem:[#allocation8 + $0x118] sm:$0xff] }
 0x29e   :  { %v1896_v49 = vcombine.low %v207_v39, %v211_v40  ;;  %v1897_v26 = vcombine.high %v207_v39, %v211_v40  ;;  %v244_v21 = vld [vmem:[#allocation8 + $0x138] sm:$0xff] }
 0x29f   :  { %v1079_v44 = vmul.f32 1.442695, %v2903_v41  ;;  %1464 = vmatprep.subr.bf16.mxu1 %v1943_v36  ;;  %v251_v36 = vld [vmem:[#allocation8 + $0x170] sm:$0xff]  ;;  %v248_v39 = vld [vmem:[#allocation8 + $0x158] sm:$0xff] }
 0x2a0   :  { %1465 = vmatpush1.bf16.msra.mxu1 %v1942_v56  ;;  %1493 = vmatprep.subr.bf16.mxu0 %v1897_v26  ;;  %v854_v28 = vpop.xlane.xlu1 %853  ;;  %v252_v40 = vld [vmem:[#allocation8 + $0x178] sm:$0xff]  ;;  %v1936_v58 = vcombine.low %v247_v35, %v251_v36  ;;  %v263_v26 = vld [vmem:[#allocation8 + $0x1d0] sm:$0xff] }
 0x2a1   :  { %2308 = vpow2.f32 %v1079_v44  ;;  %v208_v44 = vld [vmem:[#allocation8 + $0x18] sm:$0xff] }
 0x2a2   :  { %v1898_v55 = vcombine.low %v208_v44, %v212_v52  ;;  %v1899_v27 = vcombine.high %v208_v44, %v212_v52  ;;  %2310 = vlog2.f32 %v854_v28  ;;  %v1928_v44 = vcombine.low %v239_v30, %v243_v20  ;;  %v255_v52 = vld [vmem:[#allocation8 + $0x190] sm:$0xff]  ;;  %v260_v56 = vld [vmem:[#allocation8 + $0x1b8] sm:$0xff] }
 0x2a3   :  { %v1945_v63 = vcombine.high %v255_v52, %v259_v53  ;;  %v264_v28 = vld [vmem:[#allocation8 + $0x1d8] sm:$0xff]  ;;  %v2353_v30 = vld [vmem:[#allocation7 + $0xb0] sm:$0xff]  }
 0x2a4   :  { %v2354_v20 = vld [vmem:[#allocation7 + $0x78] sm:$0xff]  }
 0x2ab   :  { %v2309_v45 = vpop.eup %2308 }
 0x2ac   :  { %1081 = vadd.xlane.f32.xlu0 %v2309_v45  ;;  %v262_v45 = vld [vmem:[#allocation8 + $0x1c8] sm:$0xff]  ;;  %v2311_v33 = vpop.eup %2310 }
 0x2ad   :  { %v1951_v62 = vcombine.high %v262_v45, %v266_v48  ;;  %v1950_v23 = vcombine.low %v262_v45, %v266_v48  ;;  %v856_v37 = vmul.f32 0.6931472, %v2311_v33  ;;  %v1930_v45 = vcombine.low %v240_v19, %v244_v21 }
 0x2ae   :  { %v1937_v48 = vcombine.high %v247_v35, %v251_v36  ;;  %v1944_v33 = vcombine.low %v255_v52, %v259_v53 }
 0x2af   :  { %1466 = vmatprep.subr.bf16.mxu1 %v1951_v62  ;;  %v2909_v38 = vsub.f32 %v2899_v11, %v856_v37  ;;  %v1938_v62 = vcombine.low %v248_v39, %v252_v40 }
 0x2b0   :  { %1467 = vmatpush1.bf16.msra.mxu1 %v1950_v23 }
 0x2b1   :  { %1534 = vmatprep.subr.bf16.mxu1 %v1899_v27  ;;  %v858_v43 = vmul.f32 1.442695, %v2909_v38  ;;  %v267_v27 = vld [vmem:[#allocation8 + $0x1f0] sm:$0xff] }
 0x339   :  { %v1082_v32 = vpop.xlane.xlu0 %1081 }
 0x33a   :  { %2312 = vlog2.f32 %v1082_v32  ;;  %v268_v32 = vld [vmem:[#allocation8 + $0x1f8] sm:$0xff] }
 0x33b   :  { %2314 = vpow2.f32 %v858_v43  ;;  %v1952_v43 = vcombine.low %v263_v26, %v267_v27 }
 0x344   :  { %v2313_v42 = vpop.eup %2312 }
 0x345   :  { %v1084_v25 = vmul.f32 0.6931472, %v2313_v42  ;;  %v2913_v50 = vpop.eup %2314  ;;  %v1953_v42 = vcombine.high %v263_v26, %v267_v27 }
 0x347   :  { %v1085_v46 = vsub.f32 %v2903_v41, %v1084_v25  ;;  %v224_v41 = vld [vmem:[#allocation8 + $0x98] sm:$0xff]  ;;  %v1955_v25 = vcombine.high %v264_v28, %v268_v32 }
 0x348   :  { %v1915_v7 = vcombine.high %v224_v41, %v228_v3  ;;  %v1914_v14 = vcombine.low %v224_v41, %v228_v3  ;;  %v2339_v41 = vld [vmem:[#allocation7 + $0xd8] sm:$0xff]  }
 0x349   :  { %v1086_v47 = vmul.f32 1.442695, %v1085_v46  ;;  %v1954_v46 = vcombine.low %v264_v28, %v268_v32  ;;  %v2340_v3 = vld [vmem:[#allocation7 + $0x18] sm:$0xff]  }
 0x34b   :  { %2316 = vpow2.f32 %v1086_v47  ;;  %v2326_v47 = vld [vmem:[#allocation7 + $0x40] sm:$0xff]  }
 0x355   :  { %v2317_v51 = vpop.eup %2316 }
 0x356   :  { %v1088_v54 = vsub.f32 %v2317_v51, %v2913_v50  ;;  %v2327_v51 = vld [vmem:[#allocation7 + $0xc0] sm:$0xff]  }
 0x358   :  { %v1089_v11 = vmul.f32 5.0, %v1088_v54  ;;  %v2328_v54 = vld [vmem:[#allocation7] sm:$0xff]  }
 0x35a   :  { %v2916_v16 = vpack.c.bf16 %v1089_v11, %v1089_v11  ;;  %v2333_v11 = vld [vmem:[#allocation7 + $0x88] sm:$0xff]  }
 0x35c   :  { %1444 = vmatmul.mubr.bf16.vlgmr.msra.gmra.mrb[16].mxu0 %v2916_v16  ;;  %1485 = vmatmul.mubr.bf16.vlgmr.msra.gmra.mrb[16].mxu1 %v2916_v16 }
 0x35d   :  { %1494 = vmatpush1.bf16.msra.mxu0 %v1896_v49  ;;  %1535 = vmatpush1.bf16.msra.mxu1 %v1898_v55  ;;  %v1939_v49 = vcombine.high %v248_v39, %v252_v40  ;;  %v256_v55 = vld [vmem:[#allocation8 + $0x198] sm:$0xff] }
 0x35e   :  { %1495 = vmatprep.subr.bf16.mxu0 %v1905_v18  ;;  %1536 = vmatprep.subr.bf16.mxu1 %v1907_v0  ;;  %v1947_v23 = vcombine.high %v256_v55, %v260_v56  ;;  %v1946_v37 = vcombine.low %v256_v55, %v260_v56  ;;  %v2334_v18 = vld [vmem:[#allocation7 + $0x50] sm:$0xff]  }
 0x35f   :  { %1525 = vmatprep.mubr.bf16.mxu0 %v2516_v29  ;;  %1566 = vmatprep.mubr.bf16.mxu1 %v2516_v29  ;;  %v1931_v29 = vcombine.high %v240_v19, %v244_v21  ;;  %v2335_v0 = vld [vmem:[#allocation7 + $0xd0] sm:$0xff]   ;;  %v2355_v19 = vld [vmem:[#allocation7 + $0xf8] sm:$0xff]  }
 0x360   :  { %v2356_v21 = vld [vmem:[#allocation7 + $0x38] sm:$0xff]  }
 0x361   :  { %1496 = vmatpush1.bf16.msra.mxu0 %v1904_v4  ;;  %1537 = vmatpush1.bf16.msra.mxu1 %v1906_v5  ;;  %v2341_v4 = vld [vmem:[#allocation7 + $0x98] sm:$0xff]   ;;  %v2342_v5 = vld [vmem:[#allocation7 + $0x60] sm:$0xff]  }
 0x362   :  { %1497 = vmatprep.subr.bf16.mxu0 %v1913_v6  ;;  %1538 = vmatprep.subr.bf16.mxu1 %v1915_v7  ;;  %v2343_v6 = vld [vmem:[#allocation7 + $0xe0] sm:$0xff]  }
 0x363   :  { %v2344_v7 = vld [vmem:[#allocation7 + $0x20] sm:$0xff]  }
 0x365   :  { %1498 = vmatpush1.bf16.msra.mxu0 %v1912_v13  ;;  %1539 = vmatpush1.bf16.msra.mxu1 %v1914_v14  ;;  %v2349_v13 = vld [vmem:[#allocation7 + $0xa8] sm:$0xff]   ;;  %v2350_v14 = vld [vmem:[#allocation7 + $0x70] sm:$0xff]  }
 0x366   :  { %1499 = vmatprep.subr.bf16.mxu0 %v1921_v15  ;;  %1540 = vmatprep.subr.bf16.mxu1 %v1923_v24  ;;  %v2351_v15 = vld [vmem:[#allocation7 + $0xf0] sm:$0xff]  }
 0x367   :  { %v2352_v24 = vld [vmem:[#allocation7 + $0x30] sm:$0xff]  }
 0x369   :  { %1500 = vmatpush1.bf16.msra.mxu0 %v1920_v22  ;;  %1541 = vmatpush1.bf16.msra.mxu1 %v1922_v31  ;;  %v2357_v22 = vld [vmem:[#allocation7 + $0xb8] sm:$0xff]   ;;  %v2358_v31 = vld [vmem:[#allocation7 + $0x140] sm:$0xff]  }
 0x36a   :  { %1501 = vmatprep.subr.bf16.mxu0 %v1929_v34  ;;  %1542 = vmatprep.subr.bf16.mxu1 %v1931_v29  ;;  %v2359_v34 = vld [vmem:[#allocation7 + $0x1c0] sm:$0xff]  }
 0x36d   :  { %1502 = vmatpush1.bf16.msra.mxu0 %v1928_v44  ;;  %1543 = vmatpush1.bf16.msra.mxu1 %v1930_v45 }
 0x36e   :  { %1503 = vmatprep.subr.bf16.mxu0 %v1937_v48  ;;  %1544 = vmatprep.subr.bf16.mxu1 %v1939_v49 }
 0x371   :  { %1504 = vmatpush1.bf16.msra.mxu0 %v1936_v58  ;;  %1545 = vmatpush1.bf16.msra.mxu1 %v1938_v62 }
 0x372   :  { %1505 = vmatprep.subr.bf16.mxu0 %v1945_v63  ;;  %1546 = vmatprep.subr.bf16.mxu1 %v1947_v23 }
 0x375   :  { %1506 = vmatpush1.bf16.msra.mxu0 %v1944_v33  ;;  %1547 = vmatpush1.bf16.msra.mxu1 %v1946_v37 }
 0x376   :  { %1507 = vmatprep.subr.bf16.mxu0 %v1953_v42  ;;  %1548 = vmatprep.subr.bf16.mxu1 %v1955_v25 }
 0x379   :  { %1508 = vmatpush1.bf16.msra.mxu0 %v1952_v43  ;;  %1549 = vmatpush1.bf16.msra.mxu1 %v1954_v46 }
 0x37a   :  { %2132 = vmatprep.subr.bf16.mxu0 %v2326_v47  ;;  %2154 = vmatprep.subr.bf16.mxu1 %v2327_v51 }
 0x37c   :  { %1526 = vmatmul.mubr.bf16.vlgmr.msra.gmra.mrb[20].mxu0 %v2916_v16  ;;  %1567 = vmatmul.mubr.bf16.vlgmr.msra.gmra.mrb[20].mxu1 %v2916_v16  ;;  %v2338_v16 = vld [vmem:[#allocation7 + $0x58] sm:$0xff]  }
 0x37d   :  { %2133 = vmatpush3.bf16.msra.mxu0 %v2328_v54  ;;  %2155 = vmatpush3.bf16.msra.mxu1 %v2329_v57 }
 0x37e   :  { %2134 = vmatprep.subr.bf16.mxu0 %v2330_v59  ;;  %2156 = vmatprep.subr.bf16.mxu1 %v2331_v60 }
 0x381   :  { %2135 = vmatpush3.bf16.msra.mxu0 %v2332_v61  ;;  %2157 = vmatpush3.bf16.msra.mxu1 %v2333_v11 }
 0x382   :  { %2136 = vmatprep.subr.bf16.mxu0 %v2334_v18  ;;  %2158 = vmatprep.subr.bf16.mxu1 %v2335_v0 }
 0x385   :  { %2137 = vmatpush3.bf16.msra.mxu0 %v2336_v1  ;;  %2159 = vmatpush3.bf16.msra.mxu1 %v2337_v2 }
 0x386   :  { %2138 = vmatprep.subr.bf16.mxu0 %v2338_v16  ;;  %2160 = vmatprep.subr.bf16.mxu1 %v2339_v41 }
 0x389   :  { %2139 = vmatpush3.bf16.msra.mxu0 %v2340_v3  ;;  %2161 = vmatpush3.bf16.msra.mxu1 %v2341_v4 }
 0x38a   :  { %2140 = vmatprep.subr.bf16.mxu0 %v2342_v5  ;;  %2162 = vmatprep.subr.bf16.mxu1 %v2343_v6 }
 0x38d   :  { %2141 = vmatpush3.bf16.msra.mxu0 %v2344_v7  ;;  %2163 = vmatpush3.bf16.msra.mxu1 %v2345_v8 }
 0x38e   :  { %2142 = vmatprep.subr.bf16.mxu0 %v2346_v9  ;;  %2164 = vmatprep.subr.bf16.mxu1 %v2347_v10 }
 0x391   :  { %2143 = vmatpush3.bf16.msra.mxu0 %v2348_v12  ;;  %2165 = vmatpush3.bf16.msra.mxu1 %v2349_v13 }
 0x392   :  { %2144 = vmatprep.subr.bf16.mxu0 %v2350_v14  ;;  %2166 = vmatprep.subr.bf16.mxu1 %v2351_v15  ;;  %v2360_v14 = vld [vmem:[#allocation7 + $0x100] sm:$0xff]  }
 0x393   :  { %v2361_v15 = vld [vmem:[#allocation7 + $0x180] sm:$0xff]  }
 0x395   :  { %2145 = vmatpush3.bf16.msra.mxu0 %v2352_v24  ;;  %2167 = vmatpush3.bf16.msra.mxu1 %v2353_v30  ;;  %v2362_v24 = vld [vmem:[#allocation7 + $0x148] sm:$0xff]  }
 0x396   :  { %2146 = vmatprep.subr.bf16.mxu0 %v2354_v20  ;;  %2168 = vmatprep.subr.bf16.mxu1 %v2355_v19  ;;  %v2363_v30 = vld [vmem:[#allocation7 + $0x1c8] sm:$0xff]  }
 0x397   :  { %v2364_v20 = vld [vmem:[#allocation7 + $0x108] sm:$0xff]  }
 0x398   :  { %v2365_v19 = vld [vmem:[#allocation7 + $0x188] sm:$0xff]  }
 0x399   :  { %2147 = vmatpush3.bf16.msra.mxu0 %v2356_v21  ;;  %2169 = vmatpush3.bf16.msra.mxu1 %v2357_v22  ;;  %v2366_v21 = vld [vmem:[#allocation7 + $0x150] sm:$0xff]  }
 0x39a   :  { %2176 = vmatprep.subr.bf16.mxu0 %v2358_v31  ;;  %2198 = vmatprep.subr.bf16.mxu1 %v2359_v34  ;;  %v2367_v22 = vld [vmem:[#allocation7 + $0x1d0] sm:$0xff]  }
 0x39b   :  { %v2368_v31 = vld [vmem:[#allocation7 + $0x110] sm:$0xff]  }
 0x39c   :  { %v2369_v34 = vld [vmem:[#allocation7 + $0x190] sm:$0xff]  }
 0x42f   :  { %v1445_v29 = vpop.f32.mrb[16].mxu0  ;;  %v1486_v35 = vpop.f32.mrb[16].mxu1 }
 0x430   :  { %v1575_v36 = vmul.f32 %v1445_v29, %v1445_v29  ;;  %v1447_v39 = vpop.f32.mrb[17].mxu0  ;;  %v1488_v40 = vpop.f32.mrb[17].mxu1  ;;  %v1577_v53 = vmul.f32 %v1486_v35, %v1486_v35 }
 0x431   :  { %v1576_v44 = vmul.f32 %v1447_v39, %v1447_v39  ;;  %v1449_v45 = vpop.f32.mrb[18].mxu0  ;;  %v1490_v48 = vpop.f32.mrb[18].mxu1  ;;  %v1578_v56 = vmul.f32 %v1488_v40, %v1488_v40 }
 0x432   :  { %v1450_v49 = vpop.f32.mrb[19].mxu0  ;;  %v1491_v52 = vpop.f32.mrb[19].mxu1  ;;  %v2376_v45 = vld [vmem:[#allocation7 + $0x120] sm:$0xff]  }
 0x433   :  { %v1583_v55 = vadd.f32 %v1576_v44, %v1575_v36  ;;  %v2372_v36 = vld [vmem:[#allocation7 + $0x118] sm:$0xff]   ;;  %v2375_v44 = vld [vmem:[#allocation7 + $0x1e0] sm:$0xff]   ;;  %v2378_v49 = vld [vmem:[#allocation7 + $0x168] sm:$0xff]  }
 0x434   :  { %v2377_v48 = vld [vmem:[#allocation7 + $0x1a0] sm:$0xff]   ;;  %v2379_v52 = vld [vmem:[#allocation7 + $0x1e8] sm:$0xff]  }
 0x435   :  { %v1584_v58 = vadd.f32 %v1583_v55, %v1577_v53  ;;  %v2380_v53 = vld [vmem:[#allocation7 + $0x128] sm:$0xff]  }
 0x436   :  { %v2381_v55 = vld [vmem:[#allocation7 + $0x1a8] sm:$0xff]  }
 0x437   :  { %v1585_v62 = vadd.f32 %v1584_v58, %v1578_v56  ;;  %v2382_v56 = vld [vmem:[#allocation7 + $0x170] sm:$0xff]  }
 0x438   :  { %v2383_v58 = vld [vmem:[#allocation7 + $0x1f0] sm:$0xff]  }
 0x44f   :  { %v2924_v63 = vpop.f32.mrb[20].mxu0  ;;  %v2926_v23 = vpop.f32.mrb[20].mxu1 }
 0x450   :  { %v1579_v26 = vmul.f32 %v2924_v63, %v2924_v63  ;;  %v1529_v27 = vpop.f32.mrb[21].mxu0  ;;  %v1570_v28 = vpop.f32.mrb[21].mxu1  ;;  %v1581_v46 = vmul.f32 %v2926_v23, %v2926_v23 }
 0x451   :  { %v1580_v32 = vmul.f32 %v1529_v27, %v1529_v27  ;;  %v1531_v33 = vpop.f32.mrb[22].mxu0  ;;  %v1572_v37 = vpop.f32.mrb[22].mxu1  ;;  %v1582_v51 = vmul.f32 %v1570_v28, %v1570_v28 }
 0x452   :  { %v1586_v42 = vadd.f32 %v1585_v62, %v1579_v26  ;;  %v1532_v25 = vpop.f32.mrb[23].mxu0  ;;  %v1573_v43 = vpop.f32.mrb[23].mxu1  ;;  %v2384_v62 = vld [vmem:[#allocation7 + $0x130] sm:$0xff]   ;;  %v2388_v37 = vld [vmem:[#allocation7 + $0x138] sm:$0xff]  }
 0x453   :  { %v2385_v26 = vld [vmem:[#allocation7 + $0x1b0] sm:$0xff]  }
 0x454   :  { %v1587_v47 = vadd.f32 %v1586_v42, %v1580_v32  ;;  %v2389_v42 = vld [vmem:[#allocation7 + $0x1b8] sm:$0xff]  }
 0x456   :  { %v1588_v54 = vadd.f32 %v1587_v47, %v1581_v46 }
 0x458   :  { %v1589_v57 = vadd.f32 %v1588_v54, %v1582_v51 }
 0x45a   :  { %1590 = vadd.xlane.f32.xlu1 %v1589_v57 }
 0x4e7   :  { %v1591_v59 = vpop.xlane.xlu1 %1590 }
 0x4e8   :  { %2318 = vrsqrt.f32 %v1591_v59  ;;  %vm1594_vm2 = vcmp.eq.f32.partialorder %v1591_v59, inf  ;;  %v1597_v11 = vand.u32 2147483648, %v1591_v59  ;;  %vm1596_vm3 = vcmp.eq.f32.partialorder %v1591_v59, 0.0 }
 0x4f2   :  { %v2319_v60 = vpop.eup %2318 }
 0x4f3   :  { %v1593_v61 = vmul.f32 %v2319_v60, %v1591_v59 }
 0x4f5   :  { %v1595_v18 = vsel %vm1594_vm2, %v1591_v59, %v1593_v61 }
 0x4f6   :  { %v1598_v0 = vsel %vm1596_vm3, %v1597_v11, %v1595_v18 }
 0x4f7   :  { %v1599_v1 = vadd.f32 1e-08, %v1598_v0 }
 0x4f9   :  { %2320 = vrcp.f32 %v1599_v1 }
 0x503   :  { %v2932_v2 = vpop.eup %2320 }
 0x504   :  { %v1602_v16 = vmul.f32 %v2932_v2, %v1447_v39  ;;  %v1604_v41 = vmul.f32 %v2932_v2, %v1488_v40  ;;  %v1601_v3 = vmul.f32 %v2932_v2, %v1445_v29  ;;  %v1603_v4 = vmul.f32 %v2932_v2, %v1486_v35  ;;  %v2370_v29 = vld [vmem:[#allocation7 + $0x158] sm:$0xff]   ;;  %v2374_v40 = vld [vmem:[#allocation7 + $0x160] sm:$0xff]  }
 0x505   :  { %v1606_v5 = vmul.f32 %v2932_v2, %v1529_v27  ;;  %v1608_v6 = vmul.f32 %v2932_v2, %v1570_v28  ;;  %v2371_v35 = vld [vmem:[#allocation7 + $0x1d8] sm:$0xff]   ;;  %v1605_v32 = vmul.f32 %v2932_v2, %v2924_v63  ;;  %v1607_v33 = vmul.f32 %v2932_v2, %v2926_v23 }
 0x506   :  { %v1610_v7 = vpack.c.bf16 %v1602_v16, %v1602_v16  ;;  %v1612_v8 = vpack.c.bf16 %v1604_v41, %v1604_v41  ;;  %v1609_v9 = vpack.c.bf16 %v1601_v3, %v1601_v3  ;;  %v1611_v10 = vpack.c.bf16 %v1603_v4, %v1603_v4  ;;  %v2373_v39 = vld [vmem:[#allocation7 + $0x198] sm:$0xff]  }
 0x507   :  { %v1614_v12 = vpack.c.bf16 %v1606_v5, %v1606_v5  ;;  %v1616_v13 = vpack.c.bf16 %v1608_v6, %v1608_v6  ;;  %v2386_v27 = vld [vmem:[#allocation7 + $0x178] sm:$0xff]   ;;  %v1613_v25 = vpack.c.bf16 %v1605_v32, %v1605_v32  ;;  %v1615_v43 = vpack.c.bf16 %v1607_v33, %v1607_v33 }
 0x508   :  { %1649 = vmatprep.mubr.bf16.mxu0 %v1610_v7  ;;  %1689 = vmatprep.mubr.bf16.mxu1 %v1612_v8  ;;  %v2387_v28 = vld [vmem:[#allocation7 + $0x1f8] sm:$0xff]  }
 0x509   :  { %1650 = vmatmul.mubr.bf16.vlgmr.msra.gmra.mrb[24].mxu0 %v1609_v9  ;;  %1690 = vmatmul.mubr.bf16.vlgmr.msra.gmra.mrb[24].mxu1 %v1611_v10 }
 0x50a   :  { %2177 = vmatpush3.bf16.msra.mxu0 %v2360_v14  ;;  %2199 = vmatpush3.bf16.msra.mxu1 %v2361_v15 }
 0x50b   :  { %1729 = vmatprep.mubr.bf16.mxu0 %v1614_v12  ;;  %1769 = vmatprep.mubr.bf16.mxu1 %v1616_v13 }
 0x50c   :  { %2178 = vmatprep.subr.bf16.mxu0 %v2362_v24  ;;  %2200 = vmatprep.subr.bf16.mxu1 %v2363_v30  ;;  %v1790_v24 = vlaneseq }
 0x50e   :  { %2179 = vmatpush3.bf16.msra.mxu0 %v2364_v20  ;;  %2201 = vmatpush3.bf16.msra.mxu1 %v2365_v19  ;;  %v1791_v30 = vand.u32 127, %v1790_v24  ;;  %v1793_v20 = vshrl.u32 %v1790_v24, 7 }
 0x50f   :  { %2180 = vmatprep.subr.bf16.mxu0 %v2366_v21  ;;  %2202 = vmatprep.subr.bf16.mxu1 %v2367_v22 }
 0x510   :  { %vm1797_vm4 = vcmp.lt.s32.totalorder %v1791_v30, 10  ;;  %vm1798_vm5 = vcmp.lt.s32.totalorder %v1793_v20, 2 }
 0x511   :  { %vm1799_vm6 = vmand %vm1797_vm4, %vm1798_vm5 }
 0x512   :  { %2181 = vmatpush3.bf16.msra.mxu0 %v2368_v31  ;;  %2203 = vmatpush3.bf16.msra.mxu1 %v2369_v34 }
 0x513   :  { %2182 = vmatprep.subr.bf16.mxu0 %v2370_v29  ;;  %2204 = vmatprep.subr.bf16.mxu1 %v2371_v35 }
 0x516   :  { %2183 = vmatpush3.bf16.msra.mxu0 %v2372_v36  ;;  %2205 = vmatpush3.bf16.msra.mxu1 %v2373_v39 }
 0x517   :  { %2184 = vmatprep.subr.bf16.mxu0 %v2374_v40  ;;  %2206 = vmatprep.subr.bf16.mxu1 %v2375_v44 }
 0x51a   :  { %2185 = vmatpush3.bf16.msra.mxu0 %v2376_v45  ;;  %2207 = vmatpush3.bf16.msra.mxu1 %v2377_v48 }
 0x51b   :  { %2186 = vmatprep.subr.bf16.mxu0 %v2378_v49  ;;  %2208 = vmatprep.subr.bf16.mxu1 %v2379_v52 }
 0x51e   :  { %2187 = vmatpush3.bf16.msra.mxu0 %v2380_v53  ;;  %2209 = vmatpush3.bf16.msra.mxu1 %v2381_v55 }
 0x51f   :  { %2188 = vmatprep.subr.bf16.mxu0 %v2382_v56  ;;  %2210 = vmatprep.subr.bf16.mxu1 %v2383_v58 }
 0x522   :  { %2189 = vmatpush3.bf16.msra.mxu0 %v2384_v62  ;;  %2211 = vmatpush3.bf16.msra.mxu1 %v2385_v26 }
 0x523   :  { %2190 = vmatprep.subr.bf16.mxu0 %v2386_v27  ;;  %2212 = vmatprep.subr.bf16.mxu1 %v2387_v28 }
 0x526   :  { %2191 = vmatpush3.bf16.msra.mxu0 %v2388_v37  ;;  %2213 = vmatpush3.bf16.msra.mxu1 %v2389_v42 }
 0x529   :  { %1730 = vmatmul.mubr.bf16.vlgmr.msra.gmra.mrb[28].mxu0 %v1613_v25  ;;  %1770 = vmatmul.mubr.bf16.vlgmr.msra.gmra.mrb[28].mxu1 %v1615_v43 }
 0x5dc   :  { %v2148_v46 = vpop.f32.mrb[24].mxu0  ;;  %v2170_v47 = vpop.f32.mrb[24].mxu1 }
 0x5dd   :  { %v2149_v51 = vpop.f32.mrb[25].mxu0  ;;  %v2171_v54 = vpop.f32.mrb[25].mxu1 }
 0x5de   :  { %v2150_v57 = vadd.f32 %v2149_v51, %v2148_v46  ;;  %v2172_v59 = vadd.f32 %v2171_v54, %v2170_v47  ;;  %v2151_v60 = vpop.f32.mrb[26].mxu0  ;;  %v2173_v61 = vpop.f32.mrb[26].mxu1 }
 0x5df   :  { %v2152_v63 = vpop.f32.mrb[27].mxu0  ;;  %v2174_v11 = vpop.f32.mrb[27].mxu1 }
 0x5e0   :  { %v1692_v18 = vadd.f32 %v2172_v59, %v2150_v57 }
 0x5fc   :  { %v2192_v23 = vpop.f32.mrb[28].mxu0  ;;  %v2214_v0 = vpop.f32.mrb[28].mxu1 }
 0x5fd   :  { %v2193_v1 = vpop.f32.mrb[29].mxu0  ;;  %v2215_v2 = vpop.f32.mrb[29].mxu1 }
 0x5fe   :  { %v2194_v16 = vadd.f32 %v2193_v1, %v2192_v23  ;;  %v2216_v41 = vadd.f32 %v2215_v2, %v2214_v0  ;;  %v2195_v3 = vpop.f32.mrb[30].mxu0  ;;  %v2217_v4 = vpop.f32.mrb[30].mxu1 }
 0x5ff   :  { %v2196_v5 = vpop.f32.mrb[31].mxu0  ;;  %v2218_v6 = vpop.f32.mrb[31].mxu1 }
 0x600   :  { %v1732_v7 = vadd.f32 %v2194_v16, %v1692_v18 }
 0x602   :  { %v1772_v8 = vadd.f32 %v2216_v41, %v1732_v7 }
 0x604   :  { %v1777_v9 = vadd.f32 %v1772_v8, %v2895_v17 }
 0x606   :  { %1778 = vmax.xlane.f32.xlu0 %v1777_v9 }
 0x693   :  { %v1779_v10 = vpop.xlane.xlu0 %1778 }
 0x694   :  { %v1780_v12 = vsub.f32 %v1777_v9, %v1779_v10 }
 0x696   :  { %v1781_v13 = vmul.f32 1.442695, %v1780_v12 }
 0x698   :  { %2322 = vpow2.f32 %v1781_v13 }
 0x6a2   :  { %v2323_v14 = vpop.eup %2322 }
 0x6a3   :  { %1783 = vadd.xlane.f32.xlu1 %v2323_v14 }
 0x730   :  { %v1784_v15 = vpop.xlane.xlu1 %1783 }
 0x731   :  { %2324 = vlog2.f32 %v1784_v15 }
 0x73b   :  { %v2325_v19 = vpop.eup %2324 }
 0x73c   :  { %v1786_v21 = vmul.f32 0.6931472, %v2325_v19 }
 0x73e   :  { %v1787_v22 = vsub.f32 %v1780_v12, %v1786_v21 }
 0x740   :  { %v1788_v31 = vsub.f32 %v2909_v38, %v1787_v22 }
 0x742   :  { %v1789_v17 = vmul.f32 %v2913_v50, %v1788_v31 }
 0x744   :  { %v1800_v34 = vsel %vm1799_vm6, %v1789_v17, 0.0 }
 0x745   :  { %1801 = vst [vmem:[#allocation10] sm:$0xff] %v1800_v34 }
 0x746   :  { %2489 = shalt.err (!%p2486_p8)
}
 0x747   :  { %s2490_s22 = scalar_lea.hbm %s2964_s5, 128 }
 0x748   :  { %p2491_p9 = scmp.ne.s32.totalorder %s2964_s5, %s2490_s22  ;;  %p2494_p10 = scmp.lt.u32.totalorder %s2490_s22, %s2964_s5 }
 0x74a   :  { %p2496_p11 = pnand %p2494_p10, %p2491_p9 }
 0x74c   :  { %2499 = shalt.err (!%p2496_p11)
}
 0x74d   :  { %1811 = dma.vmem_to_hbm [thread:$0]  %s1809_s17, 128, %s2964_s5, [#allocation4]  }
 0x74e   :  { %2506 = dma.done.wait [#allocation4], 128  }
 0x74f   :  { %2507 = vsyncadd [#allocation4], 4294967168 }
 0x750   :  { %1815 = vsyncpa [#allocation3], 1 }
 0x751   :  { %1816 = vsyncpa [#allocation6], 1 }
 0x752   :  { %1817 = vsyncpa [#allocation9], 1 }
 0x753   :  { %1818 = vsyncpa [#allocation4], 1 }

</bundles_post_ra>
